<compile_context>
chip_gen: v5e
topology: v5e:2x2
jax: 0.10.0
libtpu: 0.0.40
codegen_flags: <defaults>
</compile_context>

<pallas_src>
import math

import jax
import jax.numpy as jnp
import numpy as np
from jax import lax
from jax.experimental import pallas as pl
from jax.experimental.pallas import tpu as pltpu


def make_lstm_kernel(num_layers, T, B, H, O_pad, unroll):
    H4 = 4 * H
    aligned = (B % 8 == 0)

    def kernel(*refs):
        x_ref = refs[0]                               # (T*B, D)       time-major rows
        layer_refs = refs[1:1 + 3 * num_layers]       # per layer: (D_l,4H), (H,4H), (1,4H)
        fc_w_ref = refs[1 + 3 * num_layers]           # (H, O_pad)
        fc_b_ref = refs[2 + 3 * num_layers]           # (1, O_pad)
        out_ref = refs[3 + 3 * num_layers]            # (T*B, O_pad)
        seq_scr = refs[4 + 3 * num_layers]            # VMEM (T*B, H)   layer outputs
        proj_scr = refs[5 + 3 * num_layers]           # VMEM (T*B, 4H)  hoisted X@W_ih + b

        def row_slice(t):
            start = t * B
            if aligned:
                start = pl.multiple_of(start, 8)
            return pl.ds(start, B)

        for l in range(num_layers):
            w_ih_ref, w_hh_ref, b_ref = layer_refs[3 * l:3 * l + 3]

            # --- (1) hoisted input projection for ALL timesteps: one big matmul ---
            # Layer 0 reads x; deeper layers read the previous layer's full output
            # (consumed entirely here, before the recurrence overwrites seq_scr).
            xs = x_ref[...] if l == 0 else seq_scr[...]          # (T*B, D_l)
            proj_scr[...] = (
                jnp.dot(xs, w_ih_ref[...], preferred_element_type=jnp.float32)
                + b_ref[...]                                     # (1,4H) broadcast
            )

            # --- (2) recurrence: only h @ W_hh on the serial critical path ---
            w_hh = w_hh_ref[...]                                 # hoisted, loop-invariant

            def step(t, carry):
                h, c = carry
                g = proj_scr[row_slice(t), :] + jnp.dot(
                    h, w_hh, preferred_element_type=jnp.float32)  # (B, 4H) lane-dense
                i_g = jax.nn.sigmoid(g[:, 0 * H:1 * H])
                f_g = jax.nn.sigmoid(g[:, 1 * H:2 * H])
                g_g = jnp.tanh(g[:, 2 * H:3 * H])
                o_g = jax.nn.sigmoid(g[:, 3 * H:4 * H])
                c_new = f_g * c + i_g * g_g
                h_new = o_g * jnp.tanh(c_new)
                seq_scr[row_slice(t), :] = h_new                 # single per-step store
                return h_new, c_new

            h0 = jnp.zeros((B, H), jnp.float32)
            c0 = jnp.zeros((B, H), jnp.float32)
            lax.fori_loop(0, T, step, (h0, c0), unroll=unroll)

        # --- (3) fused final Linear over all T*B rows, lane-padded output ---
        out_ref[...] = (
            jnp.dot(seq_scr[...], fc_w_ref[...], preferred_element_type=jnp.float32)
            + fc_b_ref[...]
        ).astype(out_ref.dtype)

    return kernel


def lstm_forward(x, layer_params, fc_w, fc_b):
    """x: (B, T, input_dim). layer_params: [(w_ih (D_l,4H), w_hh (H,4H), b (1,4H))].
    fc_w: (H, O), fc_b: (1, O). Returns (B, T, O), matching the torch module."""
    B, T, D = x.shape
    H = layer_params[0][1].shape[0]
    O = fc_w.shape[1]
    num_layers = len(layer_params)

    # Lane-dense FC output: pad O up to a multiple of 128 with zero weights/bias.
    O_pad = pl.cdiv(O, 128) * 128
    fc_w_p = jnp.zeros((H, O_pad), jnp.float32).at[:, :O].set(fc_w.astype(jnp.float32))
    fc_b_p = jnp.zeros((1, O_pad), jnp.float32).at[:, :O].set(fc_b.astype(jnp.float32))

    # Time-major 2D layout: row index = t*B + b.
    x2d = jnp.transpose(x, (1, 0, 2)).reshape(T * B, D).astype(jnp.float32)

    args = [x2d]
    for (w_ih, w_hh, b) in layer_params:
        args += [w_ih, w_hh, b]
    args += [fc_w_p, fc_b_p]

    unroll = True if T <= 32 else 8

    out2d = pl.pallas_call(
        make_lstm_kernel(num_layers, T, B, H, O_pad, unroll),
        out_shape=jax.ShapeDtypeStruct((T * B, O_pad), jnp.float32),
        in_specs=[pl.BlockSpec(memory_space=pltpu.MemorySpace.VMEM)] * len(args),
        out_specs=pl.BlockSpec(memory_space=pltpu.MemorySpace.VMEM),
        scratch_shapes=[pltpu.VMEM((T * B, H), jnp.float32),       # layer outputs
                        pltpu.VMEM((T * B, 4 * H), jnp.float32)],  # hoisted projections
    )(*args)

    out = out2d[:, :O].reshape(T, B, O)
    return jnp.transpose(out, (1, 0, 2))


def init_params(key, input_dim, hidden_dim, num_layers, out_dim):
    """Deterministic init mimicking PyTorch uniform(-1/sqrt(H), 1/sqrt(H)), torch layout."""
    H = hidden_dim
    stdv = 1.0 / math.sqrt(H)
    keys = jax.random.split(key, num_layers * 4 + 2)
    ki = 0
    layers = []
    for l in range(num_layers):
        D = input_dim if l == 0 else H
        w_ih = jax.random.uniform(keys[ki], (4 * H, D), jnp.float32, -stdv, stdv); ki += 1
        w_hh = jax.random.uniform(keys[ki], (4 * H, H), jnp.float32, -stdv, stdv); ki += 1
        b_ih = jax.random.uniform(keys[ki], (4 * H,), jnp.float32, -stdv, stdv); ki += 1
        b_hh = jax.random.uniform(keys[ki], (4 * H,), jnp.float32, -stdv, stdv); ki += 1
        layers.append((w_ih, w_hh, b_ih, b_hh))
    fc_w = jax.random.uniform(keys[ki], (out_dim, H), jnp.float32, -stdv, stdv); ki += 1
    fc_b = jax.random.uniform(keys[ki], (out_dim,), jnp.float32, -stdv, stdv)
    return layers, fc_w, fc_b


def pack_params(torch_layers, fc_w_t, fc_b_t):
    """torch layout (4H, D)/(4H, H)/(4H,) -> stacked-gate (D,4H)/(H,4H)/(1,4H)."""
    packed = []
    for (w_ih, w_hh, b_ih, b_hh) in torch_layers:
        H4 = w_ih.shape[0]
        packed.append((jnp.transpose(w_ih).astype(jnp.float32),
                       jnp.transpose(w_hh).astype(jnp.float32),
                       (b_ih + b_hh).reshape(1, H4).astype(jnp.float32)))
    return packed, jnp.transpose(fc_w_t).astype(jnp.float32), fc_b_t.reshape(1, -1).astype(jnp.float32)


def lstm_ref(x, torch_layers, fc_w_t, fc_b_t):
    """Pure-JAX reference using the original torch parameter layout."""
    B, T, _ = x.shape
    seq = x.astype(jnp.float32)
    for (w_ih, w_hh, b_ih, b_hh) in torch_layers:
        H = w_hh.shape[1]
        h = jnp.zeros((B, H), jnp.float32)
        c = jnp.zeros((B, H), jnp.float32)
        outs = []
        for t in range(T):
            gates = seq[:, t, :] @ w_ih.T + h @ w_hh.T + b_ih + b_hh
            i_g = jax.nn.sigmoid(gates[:, :H])
            f_g = jax.nn.sigmoid(gates[:, H:2 * H])
            g_g = jnp.tanh(gates[:, 2 * H:3 * H])
            o_g = jax.nn.sigmoid(gates[:, 3 * H:])
            c = f_g * c + i_g * g_g
            h = o_g * jnp.tanh(c)
            outs.append(h)
        seq = jnp.stack(outs, axis=1)
    return seq @ fc_w_t.T + fc_b_t


if __name__ == "__main__":
    input_dim, hidden_dim, num_layers, out_dim = 16, 32, 2, 8
    B, T = 8, 8

    key = jax.random.PRNGKey(0)
    kx, kp = jax.random.split(key)
    x = jax.random.normal(kx, (B, T, input_dim), jnp.float32)
    torch_layers, fc_w_t, fc_b_t = init_params(kp, input_dim, hidden_dim, num_layers, out_dim)
    packed_layers, fc_w, fc_b = pack_params(torch_layers, fc_w_t, fc_b_t)

    out = jax.block_until_ready(lstm_forward(x, packed_layers, fc_w, fc_b))

    ref = lstm_ref(x, torch_layers, fc_w_t, fc_b_t)
    assert out.shape == (B, T, out_dim)
    np.testing.assert_allclose(np.asarray(out), np.asarray(ref), rtol=2e-2, atol=2e-2)
    print("KERNEL_OK")
</pallas_src>

<mosaic_0001>
module attributes {stable_mosaic.version = 11 : i64} {
  func.func @kernel(%arg0: memref<64x16xf32, #tpu.memory_space<vmem>>, %arg1: memref<16x128xf32, #tpu.memory_space<vmem>>, %arg2: memref<32x128xf32, #tpu.memory_space<vmem>>, %arg3: memref<1x128xf32, #tpu.memory_space<vmem>>, %arg4: memref<32x128xf32, #tpu.memory_space<vmem>>, %arg5: memref<32x128xf32, #tpu.memory_space<vmem>>, %arg6: memref<1x128xf32, #tpu.memory_space<vmem>>, %arg7: memref<32x128xf32, #tpu.memory_space<vmem>>, %arg8: memref<1x128xf32, #tpu.memory_space<vmem>>, %arg9: memref<64x128xf32, #tpu.memory_space<vmem>>, %arg10: memref<64x32xf32, #tpu.memory_space<vmem>>, %arg11: memref<64x128xf32, #tpu.memory_space<vmem>>) attributes {dimension_semantics = [], scalar_prefetch = 0 : i64, scratch_operands = 2 : i64, tpu.core_type = #tpu.core_type<tc>} {
    %c0 = arith.constant 0 : index
    %c0_0 = arith.constant 0 : index
    %0 = vector.load %arg0[%c0, %c0_0] : memref<64x16xf32, #tpu.memory_space<vmem>>, vector<64x16xf32>
    %c0_1 = arith.constant 0 : index
    %c0_2 = arith.constant 0 : index
    %1 = vector.load %arg1[%c0_1, %c0_2] : memref<16x128xf32, #tpu.memory_space<vmem>>, vector<16x128xf32>
    %cst = arith.constant dense<0.000000e+00> : vector<64x128xf32>
    %2 = tpu.matmul %0, %1, %cst {dimension_numbers = #tpu.dot_dimension_numbers<[1], [0], [0], [1], [0, 0, 1, 1], [], []>} : vector<64x16xf32>, vector<16x128xf32>, vector<64x128xf32> -> vector<64x128xf32>
    %c0_3 = arith.constant 0 : index
    %c0_4 = arith.constant 0 : index
    %3 = vector.load %arg3[%c0_3, %c0_4] : memref<1x128xf32, #tpu.memory_space<vmem>>, vector<1x128xf32>
    %4 = vector.broadcast %3 : vector<1x128xf32> to vector<64x128xf32>
    %5 = arith.addf %2, %4 : vector<64x128xf32>
    %c0_5 = arith.constant 0 : index
    %c0_6 = arith.constant 0 : index
    %6 = vector.load %arg11[%c0_5, %c0_6] : memref<64x128xf32, #tpu.memory_space<vmem>>, vector<64x128xf32>
    tpu.vector_store %arg11[%c0_5, %c0_6], %5 {strides = array<i32>} : memref<64x128xf32, #tpu.memory_space<vmem>>, vector<64x128xf32>,
    %c0_7 = arith.constant 0 : index
    %c0_8 = arith.constant 0 : index
    %7 = vector.load %arg2[%c0_7, %c0_8] : memref<32x128xf32, #tpu.memory_space<vmem>>, vector<32x128xf32>
    %cst_9 = arith.constant 0.000000e+00 : f32
    %8 = vector.broadcast %cst_9 : f32 to vector<8x32xf32>
    %cst_10 = arith.constant 0.000000e+00 : f32
    %9 = vector.broadcast %cst_10 : f32 to vector<8x32xf32>
    %c0_i32 = arith.constant 0 : i32
    %c8_i32 = arith.constant 8 : i32
    %10 = arith.muli %c0_i32, %c8_i32 : i32
    %11 = tpu.assume_multiple %10, 8 : i32
    %12 = arith.index_cast %11 : i32 to index
    %c0_11 = arith.constant 0 : index
    %13 = vector.load %arg11[%12, %c0_11] : memref<64x128xf32, #tpu.memory_space<vmem>>, vector<8x128xf32>
    %cst_12 = arith.constant dense<0.000000e+00> : vector<8x128xf32>
    %14 = tpu.matmul %8, %7, %cst_12 {dimension_numbers = #tpu.dot_dimension_numbers<[1], [0], [0], [1], [0, 0, 1, 1], [], []>} : vector<8x32xf32>, vector<32x128xf32>, vector<8x128xf32> -> vector<8x128xf32>
    %15 = arith.addf %13, %14 : vector<8x128xf32>
    %16 = vector.extract_strided_slice %15 {offsets = [0, 0], sizes = [8, 32], strides = [1, 1]} : vector<8x128xf32> to vector<8x32xf32>
    %17 = arith.negf %16 : vector<8x32xf32>
    %18 = math.exp %17 : vector<8x32xf32>
    %cst_13 = arith.constant 1.000000e+00 : f32
    %19 = vector.broadcast %cst_13 : f32 to vector<8x32xf32>
    %20 = arith.addf %19, %18 : vector<8x32xf32>
    %21 = arith.divf %19, %20 : vector<8x32xf32>
    %22 = vector.extract_strided_slice %15 {offsets = [0, 32], sizes = [8, 32], strides = [1, 1]} : vector<8x128xf32> to vector<8x32xf32>
    %23 = arith.negf %22 : vector<8x32xf32>
    %24 = math.exp %23 : vector<8x32xf32>
    %cst_14 = arith.constant 1.000000e+00 : f32
    %25 = vector.broadcast %cst_14 : f32 to vector<8x32xf32>
    %26 = arith.addf %25, %24 : vector<8x32xf32>
    %27 = arith.divf %25, %26 : vector<8x32xf32>
    %28 = vector.extract_strided_slice %15 {offsets = [0, 64], sizes = [8, 32], strides = [1, 1]} : vector<8x128xf32> to vector<8x32xf32>
    %29 = math.tanh %28 : vector<8x32xf32>
    %30 = vector.extract_strided_slice %15 {offsets = [0, 96], sizes = [8, 32], strides = [1, 1]} : vector<8x128xf32> to vector<8x32xf32>
    %31 = arith.negf %30 : vector<8x32xf32>
    %32 = math.exp %31 : vector<8x32xf32>
    %cst_15 = arith.constant 1.000000e+00 : f32
    %33 = vector.broadcast %cst_15 : f32 to vector<8x32xf32>
    %34 = arith.addf %33, %32 : vector<8x32xf32>
    %35 = arith.divf %33, %34 : vector<8x32xf32>
    %36 = arith.mulf %27, %9 : vector<8x32xf32>
    %37 = arith.mulf %21, %29 : vector<8x32xf32>
    %38 = arith.addf %36, %37 : vector<8x32xf32>
    %39 = math.tanh %38 : vector<8x32xf32>
    %40 = arith.mulf %35, %39 : vector<8x32xf32>
    %c8_i32_16 = arith.constant 8 : i32
    %41 = arith.muli %c0_i32, %c8_i32_16 : i32
    %42 = tpu.assume_multiple %41, 8 : i32
    %43 = arith.index_cast %42 : i32 to index
    %c0_17 = arith.constant 0 : index
    %44 = vector.load %arg10[%43, %c0_17] : memref<64x32xf32, #tpu.memory_space<vmem>>, vector<8x32xf32>
    tpu.vector_store %arg10[%43, %c0_17], %40 {strides = array<i32>} : memref<64x32xf32, #tpu.memory_space<vmem>>, vector<8x32xf32>,
    %c1_i32 = arith.constant 1 : i32
    %c8_i32_18 = arith.constant 8 : i32
    %45 = arith.muli %c1_i32, %c8_i32_18 : i32
    %46 = tpu.assume_multiple %45, 8 : i32
    %47 = arith.index_cast %46 : i32 to index
    %c0_19 = arith.constant 0 : index
    %48 = vector.load %arg11[%47, %c0_19] : memref<64x128xf32, #tpu.memory_space<vmem>>, vector<8x128xf32>
    %cst_20 = arith.constant dense<0.000000e+00> : vector<8x128xf32>
    %49 = tpu.matmul %40, %7, %cst_20 {dimension_numbers = #tpu.dot_dimension_numbers<[1], [0], [0], [1], [0, 0, 1, 1], [], []>} : vector<8x32xf32>, vector<32x128xf32>, vector<8x128xf32> -> vector<8x128xf32>
    %50 = arith.addf %48, %49 : vector<8x128xf32>
    %51 = vector.extract_strided_slice %50 {offsets = [0, 0], sizes = [8, 32], strides = [1, 1]} : vector<8x128xf32> to vector<8x32xf32>
    %52 = arith.negf %51 : vector<8x32xf32>
    %53 = math.exp %52 : vector<8x32xf32>
    %cst_21 = arith.constant 1.000000e+00 : f32
    %54 = vector.broadcast %cst_21 : f32 to vector<8x32xf32>
    %55 = arith.addf %54, %53 : vector<8x32xf32>
    %56 = arith.divf %54, %55 : vector<8x32xf32>
    %57 = vector.extract_strided_slice %50 {offsets = [0, 32], sizes = [8, 32], strides = [1, 1]} : vector<8x128xf32> to vector<8x32xf32>
    %58 = arith.negf %57 : vector<8x32xf32>
    %59 = math.exp %58 : vector<8x32xf32>
    %cst_22 = arith.constant 1.000000e+00 : f32
    %60 = vector.broadcast %cst_22 : f32 to vector<8x32xf32>
    %61 = arith.addf %60, %59 : vector<8x32xf32>
    %62 = arith.divf %60, %61 : vector<8x32xf32>
    %63 = vector.extract_strided_slice %50 {offsets = [0, 64], sizes = [8, 32], strides = [1, 1]} : vector<8x128xf32> to vector<8x32xf32>
    %64 = math.tanh %63 : vector<8x32xf32>
    %65 = vector.extract_strided_slice %50 {offsets = [0, 96], sizes = [8, 32], strides = [1, 1]} : vector<8x128xf32> to vector<8x32xf32>
    %66 = arith.negf %65 : vector<8x32xf32>
    %67 = math.exp %66 : vector<8x32xf32>
    %cst_23 = arith.constant 1.000000e+00 : f32
    %68 = vector.broadcast %cst_23 : f32 to vector<8x32xf32>
    %69 = arith.addf %68, %67 : vector<8x32xf32>
    %70 = arith.divf %68, %69 : vector<8x32xf32>
    %71 = arith.mulf %62, %38 : vector<8x32xf32>
    %72 = arith.mulf %56, %64 : vector<8x32xf32>
    %73 = arith.addf %71, %72 : vector<8x32xf32>
    %74 = math.tanh %73 : vector<8x32xf32>
    %75 = arith.mulf %70, %74 : vector<8x32xf32>
    %c8_i32_24 = arith.constant 8 : i32
    %76 = arith.muli %c1_i32, %c8_i32_24 : i32
    %77 = tpu.assume_multiple %76, 8 : i32
    %78 = arith.index_cast %77 : i32 to index
    %c0_25 = arith.constant 0 : index
    %79 = vector.load %arg10[%78, %c0_25] : memref<64x32xf32, #tpu.memory_space<vmem>>, vector<8x32xf32>
    tpu.vector_store %arg10[%78, %c0_25], %75 {strides = array<i32>} : memref<64x32xf32, #tpu.memory_space<vmem>>, vector<8x32xf32>,
    %c2_i32 = arith.constant 2 : i32
    %c8_i32_26 = arith.constant 8 : i32
    %80 = arith.muli %c2_i32, %c8_i32_26 : i32
    %81 = tpu.assume_multiple %80, 8 : i32
    %82 = arith.index_cast %81 : i32 to index
    %c0_27 = arith.constant 0 : index
    %83 = vector.load %arg11[%82, %c0_27] : memref<64x128xf32, #tpu.memory_space<vmem>>, vector<8x128xf32>
    %cst_28 = arith.constant dense<0.000000e+00> : vector<8x128xf32>
    %84 = tpu.matmul %75, %7, %cst_28 {dimension_numbers = #tpu.dot_dimension_numbers<[1], [0], [0], [1], [0, 0, 1, 1], [], []>} : vector<8x32xf32>, vector<32x128xf32>, vector<8x128xf32> -> vector<8x128xf32>
    %85 = arith.addf %83, %84 : vector<8x128xf32>
    %86 = vector.extract_strided_slice %85 {offsets = [0, 0], sizes = [8, 32], strides = [1, 1]} : vector<8x128xf32> to vector<8x32xf32>
    %87 = arith.negf %86 : vector<8x32xf32>
    %88 = math.exp %87 : vector<8x32xf32>
    %cst_29 = arith.constant 1.000000e+00 : f32
    %89 = vector.broadcast %cst_29 : f32 to vector<8x32xf32>
    %90 = arith.addf %89, %88 : vector<8x32xf32>
    %91 = arith.divf %89, %90 : vector<8x32xf32>
    %92 = vector.extract_strided_slice %85 {offsets = [0, 32], sizes = [8, 32], strides = [1, 1]} : vector<8x128xf32> to vector<8x32xf32>
    %93 = arith.negf %92 : vector<8x32xf32>
    %94 = math.exp %93 : vector<8x32xf32>
    %cst_30 = arith.constant 1.000000e+00 : f32
    %95 = vector.broadcast %cst_30 : f32 to vector<8x32xf32>
    %96 = arith.addf %95, %94 : vector<8x32xf32>
    %97 = arith.divf %95, %96 : vector<8x32xf32>
    %98 = vector.extract_strided_slice %85 {offsets = [0, 64], sizes = [8, 32], strides = [1, 1]} : vector<8x128xf32> to vector<8x32xf32>
    %99 = math.tanh %98 : vector<8x32xf32>
    %100 = vector.extract_strided_slice %85 {offsets = [0, 96], sizes = [8, 32], strides = [1, 1]} : vector<8x128xf32> to vector<8x32xf32>
    %101 = arith.negf %100 : vector<8x32xf32>
    %102 = math.exp %101 : vector<8x32xf32>
    %cst_31 = arith.constant 1.000000e+00 : f32
    %103 = vector.broadcast %cst_31 : f32 to vector<8x32xf32>
    %104 = arith.addf %103, %102 : vector<8x32xf32>
    %105 = arith.divf %103, %104 : vector<8x32xf32>
    %106 = arith.mulf %97, %73 : vector<8x32xf32>
    %107 = arith.mulf %91, %99 : vector<8x32xf32>
    %108 = arith.addf %106, %107 : vector<8x32xf32>
    %109 = math.tanh %108 : vector<8x32xf32>
    %110 = arith.mulf %105, %109 : vector<8x32xf32>
    %c8_i32_32 = arith.constant 8 : i32
    %111 = arith.muli %c2_i32, %c8_i32_32 : i32
    %112 = tpu.assume_multiple %111, 8 : i32
    %113 = arith.index_cast %112 : i32 to index
    %c0_33 = arith.constant 0 : index
    %114 = vector.load %arg10[%113, %c0_33] : memref<64x32xf32, #tpu.memory_space<vmem>>, vector<8x32xf32>
    tpu.vector_store %arg10[%113, %c0_33], %110 {strides = array<i32>} : memref<64x32xf32, #tpu.memory_space<vmem>>, vector<8x32xf32>,
    %c3_i32 = arith.constant 3 : i32
    %c8_i32_34 = arith.constant 8 : i32
    %115 = arith.muli %c3_i32, %c8_i32_34 : i32
    %116 = tpu.assume_multiple %115, 8 : i32
    %117 = arith.index_cast %116 : i32 to index
    %c0_35 = arith.constant 0 : index
    %118 = vector.load %arg11[%117, %c0_35] : memref<64x128xf32, #tpu.memory_space<vmem>>, vector<8x128xf32>
    %cst_36 = arith.constant dense<0.000000e+00> : vector<8x128xf32>
    %119 = tpu.matmul %110, %7, %cst_36 {dimension_numbers = #tpu.dot_dimension_numbers<[1], [0], [0], [1], [0, 0, 1, 1], [], []>} : vector<8x32xf32>, vector<32x128xf32>, vector<8x128xf32> -> vector<8x128xf32>
    %120 = arith.addf %118, %119 : vector<8x128xf32>
    %121 = vector.extract_strided_slice %120 {offsets = [0, 0], sizes = [8, 32], strides = [1, 1]} : vector<8x128xf32> to vector<8x32xf32>
    %122 = arith.negf %121 : vector<8x32xf32>
    %123 = math.exp %122 : vector<8x32xf32>
    %cst_37 = arith.constant 1.000000e+00 : f32
    %124 = vector.broadcast %cst_37 : f32 to vector<8x32xf32>
    %125 = arith.addf %124, %123 : vector<8x32xf32>
    %126 = arith.divf %124, %125 : vector<8x32xf32>
    %127 = vector.extract_strided_slice %120 {offsets = [0, 32], sizes = [8, 32], strides = [1, 1]} : vector<8x128xf32> to vector<8x32xf32>
    %128 = arith.negf %127 : vector<8x32xf32>
    %129 = math.exp %128 : vector<8x32xf32>
    %cst_38 = arith.constant 1.000000e+00 : f32
    %130 = vector.broadcast %cst_38 : f32 to vector<8x32xf32>
    %131 = arith.addf %130, %129 : vector<8x32xf32>
    %132 = arith.divf %130, %131 : vector<8x32xf32>
    %133 = vector.extract_strided_slice %120 {offsets = [0, 64], sizes = [8, 32], strides = [1, 1]} : vector<8x128xf32> to vector<8x32xf32>
    %134 = math.tanh %133 : vector<8x32xf32>
    %135 = vector.extract_strided_slice %120 {offsets = [0, 96], sizes = [8, 32], strides = [1, 1]} : vector<8x128xf32> to vector<8x32xf32>
    %136 = arith.negf %135 : vector<8x32xf32>
    %137 = math.exp %136 : vector<8x32xf32>
    %cst_39 = arith.constant 1.000000e+00 : f32
    %138 = vector.broadcast %cst_39 : f32 to vector<8x32xf32>
    %139 = arith.addf %138, %137 : vector<8x32xf32>
    %140 = arith.divf %138, %139 : vector<8x32xf32>
    %141 = arith.mulf %132, %108 : vector<8x32xf32>
    %142 = arith.mulf %126, %134 : vector<8x32xf32>
    %143 = arith.addf %141, %142 : vector<8x32xf32>
    %144 = math.tanh %143 : vector<8x32xf32>
    %145 = arith.mulf %140, %144 : vector<8x32xf32>
    %c8_i32_40 = arith.constant 8 : i32
    %146 = arith.muli %c3_i32, %c8_i32_40 : i32
    %147 = tpu.assume_multiple %146, 8 : i32
    %148 = arith.index_cast %147 : i32 to index
    %c0_41 = arith.constant 0 : index
    %149 = vector.load %arg10[%148, %c0_41] : memref<64x32xf32, #tpu.memory_space<vmem>>, vector<8x32xf32>
    tpu.vector_store %arg10[%148, %c0_41], %145 {strides = array<i32>} : memref<64x32xf32, #tpu.memory_space<vmem>>, vector<8x32xf32>,
    %c4_i32 = arith.constant 4 : i32
    %c8_i32_42 = arith.constant 8 : i32
    %150 = arith.muli %c4_i32, %c8_i32_42 : i32
    %151 = tpu.assume_multiple %150, 8 : i32
    %152 = arith.index_cast %151 : i32 to index
    %c0_43 = arith.constant 0 : index
    %153 = vector.load %arg11[%152, %c0_43] : memref<64x128xf32, #tpu.memory_space<vmem>>, vector<8x128xf32>
    %cst_44 = arith.constant dense<0.000000e+00> : vector<8x128xf32>
    %154 = tpu.matmul %145, %7, %cst_44 {dimension_numbers = #tpu.dot_dimension_numbers<[1], [0], [0], [1], [0, 0, 1, 1], [], []>} : vector<8x32xf32>, vector<32x128xf32>, vector<8x128xf32> -> vector<8x128xf32>
    %155 = arith.addf %153, %154 : vector<8x128xf32>
    %156 = vector.extract_strided_slice %155 {offsets = [0, 0], sizes = [8, 32], strides = [1, 1]} : vector<8x128xf32> to vector<8x32xf32>
    %157 = arith.negf %156 : vector<8x32xf32>
    %158 = math.exp %157 : vector<8x32xf32>
    %cst_45 = arith.constant 1.000000e+00 : f32
    %159 = vector.broadcast %cst_45 : f32 to vector<8x32xf32>
    %160 = arith.addf %159, %158 : vector<8x32xf32>
    %161 = arith.divf %159, %160 : vector<8x32xf32>
    %162 = vector.extract_strided_slice %155 {offsets = [0, 32], sizes = [8, 32], strides = [1, 1]} : vector<8x128xf32> to vector<8x32xf32>
    %163 = arith.negf %162 : vector<8x32xf32>
    %164 = math.exp %163 : vector<8x32xf32>
    %cst_46 = arith.constant 1.000000e+00 : f32
    %165 = vector.broadcast %cst_46 : f32 to vector<8x32xf32>
    %166 = arith.addf %165, %164 : vector<8x32xf32>
    %167 = arith.divf %165, %166 : vector<8x32xf32>
    %168 = vector.extract_strided_slice %155 {offsets = [0, 64], sizes = [8, 32], strides = [1, 1]} : vector<8x128xf32> to vector<8x32xf32>
    %169 = math.tanh %168 : vector<8x32xf32>
    %170 = vector.extract_strided_slice %155 {offsets = [0, 96], sizes = [8, 32], strides = [1, 1]} : vector<8x128xf32> to vector<8x32xf32>
    %171 = arith.negf %170 : vector<8x32xf32>
    %172 = math.exp %171 : vector<8x32xf32>
    %cst_47 = arith.constant 1.000000e+00 : f32
    %173 = vector.broadcast %cst_47 : f32 to vector<8x32xf32>
    %174 = arith.addf %173, %172 : vector<8x32xf32>
    %175 = arith.divf %173, %174 : vector<8x32xf32>
    %176 = arith.mulf %167, %143 : vector<8x32xf32>
    %177 = arith.mulf %161, %169 : vector<8x32xf32>
    %178 = arith.addf %176, %177 : vector<8x32xf32>
    %179 = math.tanh %178 : vector<8x32xf32>
    %180 = arith.mulf %175, %179 : vector<8x32xf32>
    %c8_i32_48 = arith.constant 8 : i32
    %181 = arith.muli %c4_i32, %c8_i32_48 : i32
    %182 = tpu.assume_multiple %181, 8 : i32
    %183 = arith.index_cast %182 : i32 to index
    %c0_49 = arith.constant 0 : index
    %184 = vector.load %arg10[%183, %c0_49] : memref<64x32xf32, #tpu.memory_space<vmem>>, vector<8x32xf32>
    tpu.vector_store %arg10[%183, %c0_49], %180 {strides = array<i32>} : memref<64x32xf32, #tpu.memory_space<vmem>>, vector<8x32xf32>,
    %c5_i32 = arith.constant 5 : i32
    %c8_i32_50 = arith.constant 8 : i32
    %185 = arith.muli %c5_i32, %c8_i32_50 : i32
    %186 = tpu.assume_multiple %185, 8 : i32
    %187 = arith.index_cast %186 : i32 to index
    %c0_51 = arith.constant 0 : index
    %188 = vector.load %arg11[%187, %c0_51] : memref<64x128xf32, #tpu.memory_space<vmem>>, vector<8x128xf32>
    %cst_52 = arith.constant dense<0.000000e+00> : vector<8x128xf32>
    %189 = tpu.matmul %180, %7, %cst_52 {dimension_numbers = #tpu.dot_dimension_numbers<[1], [0], [0], [1], [0, 0, 1, 1], [], []>} : vector<8x32xf32>, vector<32x128xf32>, vector<8x128xf32> -> vector<8x128xf32>
    %190 = arith.addf %188, %189 : vector<8x128xf32>
    %191 = vector.extract_strided_slice %190 {offsets = [0, 0], sizes = [8, 32], strides = [1, 1]} : vector<8x128xf32> to vector<8x32xf32>
    %192 = arith.negf %191 : vector<8x32xf32>
    %193 = math.exp %192 : vector<8x32xf32>
    %cst_53 = arith.constant 1.000000e+00 : f32
    %194 = vector.broadcast %cst_53 : f32 to vector<8x32xf32>
    %195 = arith.addf %194, %193 : vector<8x32xf32>
    %196 = arith.divf %194, %195 : vector<8x32xf32>
    %197 = vector.extract_strided_slice %190 {offsets = [0, 32], sizes = [8, 32], strides = [1, 1]} : vector<8x128xf32> to vector<8x32xf32>
    %198 = arith.negf %197 : vector<8x32xf32>
    %199 = math.exp %198 : vector<8x32xf32>
    %cst_54 = arith.constant 1.000000e+00 : f32
    %200 = vector.broadcast %cst_54 : f32 to vector<8x32xf32>
    %201 = arith.addf %200, %199 : vector<8x32xf32>
    %202 = arith.divf %200, %201 : vector<8x32xf32>
    %203 = vector.extract_strided_slice %190 {offsets = [0, 64], sizes = [8, 32], strides = [1, 1]} : vector<8x128xf32> to vector<8x32xf32>
    %204 = math.tanh %203 : vector<8x32xf32>
    %205 = vector.extract_strided_slice %190 {offsets = [0, 96], sizes = [8, 32], strides = [1, 1]} : vector<8x128xf32> to vector<8x32xf32>
    %206 = arith.negf %205 : vector<8x32xf32>
    %207 = math.exp %206 : vector<8x32xf32>
    %cst_55 = arith.constant 1.000000e+00 : f32
    %208 = vector.broadcast %cst_55 : f32 to vector<8x32xf32>
    %209 = arith.addf %208, %207 : vector<8x32xf32>
    %210 = arith.divf %208, %209 : vector<8x32xf32>
    %211 = arith.mulf %202, %178 : vector<8x32xf32>
    %212 = arith.mulf %196, %204 : vector<8x32xf32>
    %213 = arith.addf %211, %212 : vector<8x32xf32>
    %214 = math.tanh %213 : vector<8x32xf32>
    %215 = arith.mulf %210, %214 : vector<8x32xf32>
    %c8_i32_56 = arith.constant 8 : i32
    %216 = arith.muli %c5_i32, %c8_i32_56 : i32
    %217 = tpu.assume_multiple %216, 8 : i32
    %218 = arith.index_cast %217 : i32 to index
    %c0_57 = arith.constant 0 : index
    %219 = vector.load %arg10[%218, %c0_57] : memref<64x32xf32, #tpu.memory_space<vmem>>, vector<8x32xf32>
    tpu.vector_store %arg10[%218, %c0_57], %215 {strides = array<i32>} : memref<64x32xf32, #tpu.memory_space<vmem>>, vector<8x32xf32>,
    %c6_i32 = arith.constant 6 : i32
    %c8_i32_58 = arith.constant 8 : i32
    %220 = arith.muli %c6_i32, %c8_i32_58 : i32
    %221 = tpu.assume_multiple %220, 8 : i32
    %222 = arith.index_cast %221 : i32 to index
    %c0_59 = arith.constant 0 : index
    %223 = vector.load %arg11[%222, %c0_59] : memref<64x128xf32, #tpu.memory_space<vmem>>, vector<8x128xf32>
    %cst_60 = arith.constant dense<0.000000e+00> : vector<8x128xf32>
    %224 = tpu.matmul %215, %7, %cst_60 {dimension_numbers = #tpu.dot_dimension_numbers<[1], [0], [0], [1], [0, 0, 1, 1], [], []>} : vector<8x32xf32>, vector<32x128xf32>, vector<8x128xf32> -> vector<8x128xf32>
    %225 = arith.addf %223, %224 : vector<8x128xf32>
    %226 = vector.extract_strided_slice %225 {offsets = [0, 0], sizes = [8, 32], strides = [1, 1]} : vector<8x128xf32> to vector<8x32xf32>
    %227 = arith.negf %226 : vector<8x32xf32>
    %228 = math.exp %227 : vector<8x32xf32>
    %cst_61 = arith.constant 1.000000e+00 : f32
    %229 = vector.broadcast %cst_61 : f32 to vector<8x32xf32>
    %230 = arith.addf %229, %228 : vector<8x32xf32>
    %231 = arith.divf %229, %230 : vector<8x32xf32>
    %232 = vector.extract_strided_slice %225 {offsets = [0, 32], sizes = [8, 32], strides = [1, 1]} : vector<8x128xf32> to vector<8x32xf32>
    %233 = arith.negf %232 : vector<8x32xf32>
    %234 = math.exp %233 : vector<8x32xf32>
    %cst_62 = arith.constant 1.000000e+00 : f32
    %235 = vector.broadcast %cst_62 : f32 to vector<8x32xf32>
    %236 = arith.addf %235, %234 : vector<8x32xf32>
    %237 = arith.divf %235, %236 : vector<8x32xf32>
    %238 = vector.extract_strided_slice %225 {offsets = [0, 64], sizes = [8, 32], strides = [1, 1]} : vector<8x128xf32> to vector<8x32xf32>
    %239 = math.tanh %238 : vector<8x32xf32>
    %240 = vector.extract_strided_slice %225 {offsets = [0, 96], sizes = [8, 32], strides = [1, 1]} : vector<8x128xf32> to vector<8x32xf32>
    %241 = arith.negf %240 : vector<8x32xf32>
    %242 = math.exp %241 : vector<8x32xf32>
    %cst_63 = arith.constant 1.000000e+00 : f32
    %243 = vector.broadcast %cst_63 : f32 to vector<8x32xf32>
    %244 = arith.addf %243, %242 : vector<8x32xf32>
    %245 = arith.divf %243, %244 : vector<8x32xf32>
    %246 = arith.mulf %237, %213 : vector<8x32xf32>
    %247 = arith.mulf %231, %239 : vector<8x32xf32>
    %248 = arith.addf %246, %247 : vector<8x32xf32>
    %249 = math.tanh %248 : vector<8x32xf32>
    %250 = arith.mulf %245, %249 : vector<8x32xf32>
    %c8_i32_64 = arith.constant 8 : i32
    %251 = arith.muli %c6_i32, %c8_i32_64 : i32
    %252 = tpu.assume_multiple %251, 8 : i32
    %253 = arith.index_cast %252 : i32 to index
    %c0_65 = arith.constant 0 : index
    %254 = vector.load %arg10[%253, %c0_65] : memref<64x32xf32, #tpu.memory_space<vmem>>, vector<8x32xf32>
    tpu.vector_store %arg10[%253, %c0_65], %250 {strides = array<i32>} : memref<64x32xf32, #tpu.memory_space<vmem>>, vector<8x32xf32>,
    %c7_i32 = arith.constant 7 : i32
    %c8_i32_66 = arith.constant 8 : i32
    %255 = arith.muli %c7_i32, %c8_i32_66 : i32
    %256 = tpu.assume_multiple %255, 8 : i32
    %257 = arith.index_cast %256 : i32 to index
    %c0_67 = arith.constant 0 : index
    %258 = vector.load %arg11[%257, %c0_67] : memref<64x128xf32, #tpu.memory_space<vmem>>, vector<8x128xf32>
    %cst_68 = arith.constant dense<0.000000e+00> : vector<8x128xf32>
    %259 = tpu.matmul %250, %7, %cst_68 {dimension_numbers = #tpu.dot_dimension_numbers<[1], [0], [0], [1], [0, 0, 1, 1], [], []>} : vector<8x32xf32>, vector<32x128xf32>, vector<8x128xf32> -> vector<8x128xf32>
    %260 = arith.addf %258, %259 : vector<8x128xf32>
    %261 = vector.extract_strided_slice %260 {offsets = [0, 0], sizes = [8, 32], strides = [1, 1]} : vector<8x128xf32> to vector<8x32xf32>
    %262 = arith.negf %261 : vector<8x32xf32>
    %263 = math.exp %262 : vector<8x32xf32>
    %cst_69 = arith.constant 1.000000e+00 : f32
    %264 = vector.broadcast %cst_69 : f32 to vector<8x32xf32>
    %265 = arith.addf %264, %263 : vector<8x32xf32>
    %266 = arith.divf %264, %265 : vector<8x32xf32>
    %267 = vector.extract_strided_slice %260 {offsets = [0, 32], sizes = [8, 32], strides = [1, 1]} : vector<8x128xf32> to vector<8x32xf32>
    %268 = arith.negf %267 : vector<8x32xf32>
    %269 = math.exp %268 : vector<8x32xf32>
    %cst_70 = arith.constant 1.000000e+00 : f32
    %270 = vector.broadcast %cst_70 : f32 to vector<8x32xf32>
    %271 = arith.addf %270, %269 : vector<8x32xf32>
    %272 = arith.divf %270, %271 : vector<8x32xf32>
    %273 = vector.extract_strided_slice %260 {offsets = [0, 64], sizes = [8, 32], strides = [1, 1]} : vector<8x128xf32> to vector<8x32xf32>
    %274 = math.tanh %273 : vector<8x32xf32>
    %275 = vector.extract_strided_slice %260 {offsets = [0, 96], sizes = [8, 32], strides = [1, 1]} : vector<8x128xf32> to vector<8x32xf32>
    %276 = arith.negf %275 : vector<8x32xf32>
    %277 = math.exp %276 : vector<8x32xf32>
    %cst_71 = arith.constant 1.000000e+00 : f32
    %278 = vector.broadcast %cst_71 : f32 to vector<8x32xf32>
    %279 = arith.addf %278, %277 : vector<8x32xf32>
    %280 = arith.divf %278, %279 : vector<8x32xf32>
    %281 = arith.mulf %272, %248 : vector<8x32xf32>
    %282 = arith.mulf %266, %274 : vector<8x32xf32>
    %283 = arith.addf %281, %282 : vector<8x32xf32>
    %284 = math.tanh %283 : vector<8x32xf32>
    %285 = arith.mulf %280, %284 : vector<8x32xf32>
    %c8_i32_72 = arith.constant 8 : i32
    %286 = arith.muli %c7_i32, %c8_i32_72 : i32
    %287 = tpu.assume_multiple %286, 8 : i32
    %288 = arith.index_cast %287 : i32 to index
    %c0_73 = arith.constant 0 : index
    %289 = vector.load %arg10[%288, %c0_73] : memref<64x32xf32, #tpu.memory_space<vmem>>, vector<8x32xf32>
    tpu.vector_store %arg10[%288, %c0_73], %285 {strides = array<i32>} : memref<64x32xf32, #tpu.memory_space<vmem>>, vector<8x32xf32>,
    %c8_i32_74 = arith.constant 8 : i32
    %c0_75 = arith.constant 0 : index
    %c0_76 = arith.constant 0 : index
    %290 = vector.load %arg10[%c0_75, %c0_76] : memref<64x32xf32, #tpu.memory_space<vmem>>, vector<64x32xf32>
    %c0_77 = arith.constant 0 : index
    %c0_78 = arith.constant 0 : index
    %291 = vector.load %arg4[%c0_77, %c0_78] : memref<32x128xf32, #tpu.memory_space<vmem>>, vector<32x128xf32>
    %cst_79 = arith.constant dense<0.000000e+00> : vector<64x128xf32>
    %292 = tpu.matmul %290, %291, %cst_79 {dimension_numbers = #tpu.dot_dimension_numbers<[1], [0], [0], [1], [0, 0, 1, 1], [], []>} : vector<64x32xf32>, vector<32x128xf32>, vector<64x128xf32> -> vector<64x128xf32>
    %c0_80 = arith.constant 0 : index
    %c0_81 = arith.constant 0 : index
    %293 = vector.load %arg6[%c0_80, %c0_81] : memref<1x128xf32, #tpu.memory_space<vmem>>, vector<1x128xf32>
    %294 = vector.broadcast %293 : vector<1x128xf32> to vector<64x128xf32>
    %295 = arith.addf %292, %294 : vector<64x128xf32>
    %c0_82 = arith.constant 0 : index
    %c0_83 = arith.constant 0 : index
    %296 = vector.load %arg11[%c0_82, %c0_83] : memref<64x128xf32, #tpu.memory_space<vmem>>, vector<64x128xf32>
    tpu.vector_store %arg11[%c0_82, %c0_83], %295 {strides = array<i32>} : memref<64x128xf32, #tpu.memory_space<vmem>>, vector<64x128xf32>,
    %c0_84 = arith.constant 0 : index
    %c0_85 = arith.constant 0 : index
    %297 = vector.load %arg5[%c0_84, %c0_85] : memref<32x128xf32, #tpu.memory_space<vmem>>, vector<32x128xf32>
    %cst_86 = arith.constant 0.000000e+00 : f32
    %298 = vector.broadcast %cst_86 : f32 to vector<8x32xf32>
    %cst_87 = arith.constant 0.000000e+00 : f32
    %299 = vector.broadcast %cst_87 : f32 to vector<8x32xf32>
    %c0_i32_88 = arith.constant 0 : i32
    %c8_i32_89 = arith.constant 8 : i32
    %300 = arith.muli %c0_i32_88, %c8_i32_89 : i32
    %301 = tpu.assume_multiple %300, 8 : i32
    %302 = arith.index_cast %301 : i32 to index
    %c0_90 = arith.constant 0 : index
    %303 = vector.load %arg11[%302, %c0_90] : memref<64x128xf32, #tpu.memory_space<vmem>>, vector<8x128xf32>
    %cst_91 = arith.constant dense<0.000000e+00> : vector<8x128xf32>
    %304 = tpu.matmul %298, %297, %cst_91 {dimension_numbers = #tpu.dot_dimension_numbers<[1], [0], [0], [1], [0, 0, 1, 1], [], []>} : vector<8x32xf32>, vector<32x128xf32>, vector<8x128xf32> -> vector<8x128xf32>
    %305 = arith.addf %303, %304 : vector<8x128xf32>
    %306 = vector.extract_strided_slice %305 {offsets = [0, 0], sizes = [8, 32], strides = [1, 1]} : vector<8x128xf32> to vector<8x32xf32>
    %307 = arith.negf %306 : vector<8x32xf32>
    %308 = math.exp %307 : vector<8x32xf32>
    %cst_92 = arith.constant 1.000000e+00 : f32
    %309 = vector.broadcast %cst_92 : f32 to vector<8x32xf32>
    %310 = arith.addf %309, %308 : vector<8x32xf32>
    %311 = arith.divf %309, %310 : vector<8x32xf32>
    %312 = vector.extract_strided_slice %305 {offsets = [0, 32], sizes = [8, 32], strides = [1, 1]} : vector<8x128xf32> to vector<8x32xf32>
    %313 = arith.negf %312 : vector<8x32xf32>
    %314 = math.exp %313 : vector<8x32xf32>
    %cst_93 = arith.constant 1.000000e+00 : f32
    %315 = vector.broadcast %cst_93 : f32 to vector<8x32xf32>
    %316 = arith.addf %315, %314 : vector<8x32xf32>
    %317 = arith.divf %315, %316 : vector<8x32xf32>
    %318 = vector.extract_strided_slice %305 {offsets = [0, 64], sizes = [8, 32], strides = [1, 1]} : vector<8x128xf32> to vector<8x32xf32>
    %319 = math.tanh %318 : vector<8x32xf32>
    %320 = vector.extract_strided_slice %305 {offsets = [0, 96], sizes = [8, 32], strides = [1, 1]} : vector<8x128xf32> to vector<8x32xf32>
    %321 = arith.negf %320 : vector<8x32xf32>
    %322 = math.exp %321 : vector<8x32xf32>
    %cst_94 = arith.constant 1.000000e+00 : f32
    %323 = vector.broadcast %cst_94 : f32 to vector<8x32xf32>
    %324 = arith.addf %323, %322 : vector<8x32xf32>
    %325 = arith.divf %323, %324 : vector<8x32xf32>
    %326 = arith.mulf %317, %299 : vector<8x32xf32>
    %327 = arith.mulf %311, %319 : vector<8x32xf32>
    %328 = arith.addf %326, %327 : vector<8x32xf32>
    %329 = math.tanh %328 : vector<8x32xf32>
    %330 = arith.mulf %325, %329 : vector<8x32xf32>
    %c8_i32_95 = arith.constant 8 : i32
    %331 = arith.muli %c0_i32_88, %c8_i32_95 : i32
    %332 = tpu.assume_multiple %331, 8 : i32
    %333 = arith.index_cast %332 : i32 to index
    %c0_96 = arith.constant 0 : index
    %334 = vector.load %arg10[%333, %c0_96] : memref<64x32xf32, #tpu.memory_space<vmem>>, vector<8x32xf32>
    tpu.vector_store %arg10[%333, %c0_96], %330 {strides = array<i32>} : memref<64x32xf32, #tpu.memory_space<vmem>>, vector<8x32xf32>,
    %c1_i32_97 = arith.constant 1 : i32
    %c8_i32_98 = arith.constant 8 : i32
    %335 = arith.muli %c1_i32_97, %c8_i32_98 : i32
    %336 = tpu.assume_multiple %335, 8 : i32
    %337 = arith.index_cast %336 : i32 to index
    %c0_99 = arith.constant 0 : index
    %338 = vector.load %arg11[%337, %c0_99] : memref<64x128xf32, #tpu.memory_space<vmem>>, vector<8x128xf32>
    %cst_100 = arith.constant dense<0.000000e+00> : vector<8x128xf32>
    %339 = tpu.matmul %330, %297, %cst_100 {dimension_numbers = #tpu.dot_dimension_numbers<[1], [0], [0], [1], [0, 0, 1, 1], [], []>} : vector<8x32xf32>, vector<32x128xf32>, vector<8x128xf32> -> vector<8x128xf32>
    %340 = arith.addf %338, %339 : vector<8x128xf32>
    %341 = vector.extract_strided_slice %340 {offsets = [0, 0], sizes = [8, 32], strides = [1, 1]} : vector<8x128xf32> to vector<8x32xf32>
    %342 = arith.negf %341 : vector<8x32xf32>
    %343 = math.exp %342 : vector<8x32xf32>
    %cst_101 = arith.constant 1.000000e+00 : f32
    %344 = vector.broadcast %cst_101 : f32 to vector<8x32xf32>
    %345 = arith.addf %344, %343 : vector<8x32xf32>
    %346 = arith.divf %344, %345 : vector<8x32xf32>
    %347 = vector.extract_strided_slice %340 {offsets = [0, 32], sizes = [8, 32], strides = [1, 1]} : vector<8x128xf32> to vector<8x32xf32>
    %348 = arith.negf %347 : vector<8x32xf32>
    %349 = math.exp %348 : vector<8x32xf32>
    %cst_102 = arith.constant 1.000000e+00 : f32
    %350 = vector.broadcast %cst_102 : f32 to vector<8x32xf32>
    %351 = arith.addf %350, %349 : vector<8x32xf32>
    %352 = arith.divf %350, %351 : vector<8x32xf32>
    %353 = vector.extract_strided_slice %340 {offsets = [0, 64], sizes = [8, 32], strides = [1, 1]} : vector<8x128xf32> to vector<8x32xf32>
    %354 = math.tanh %353 : vector<8x32xf32>
    %355 = vector.extract_strided_slice %340 {offsets = [0, 96], sizes = [8, 32], strides = [1, 1]} : vector<8x128xf32> to vector<8x32xf32>
    %356 = arith.negf %355 : vector<8x32xf32>
    %357 = math.exp %356 : vector<8x32xf32>
    %cst_103 = arith.constant 1.000000e+00 : f32
    %358 = vector.broadcast %cst_103 : f32 to vector<8x32xf32>
    %359 = arith.addf %358, %357 : vector<8x32xf32>
    %360 = arith.divf %358, %359 : vector<8x32xf32>
    %361 = arith.mulf %352, %328 : vector<8x32xf32>
    %362 = arith.mulf %346, %354 : vector<8x32xf32>
    %363 = arith.addf %361, %362 : vector<8x32xf32>
    %364 = math.tanh %363 : vector<8x32xf32>
    %365 = arith.mulf %360, %364 : vector<8x32xf32>
    %c8_i32_104 = arith.constant 8 : i32
    %366 = arith.muli %c1_i32_97, %c8_i32_104 : i32
    %367 = tpu.assume_multiple %366, 8 : i32
    %368 = arith.index_cast %367 : i32 to index
    %c0_105 = arith.constant 0 : index
    %369 = vector.load %arg10[%368, %c0_105] : memref<64x32xf32, #tpu.memory_space<vmem>>, vector<8x32xf32>
    tpu.vector_store %arg10[%368, %c0_105], %365 {strides = array<i32>} : memref<64x32xf32, #tpu.memory_space<vmem>>, vector<8x32xf32>,
    %c2_i32_106 = arith.constant 2 : i32
    %c8_i32_107 = arith.constant 8 : i32
    %370 = arith.muli %c2_i32_106, %c8_i32_107 : i32
    %371 = tpu.assume_multiple %370, 8 : i32
    %372 = arith.index_cast %371 : i32 to index
    %c0_108 = arith.constant 0 : index
    %373 = vector.load %arg11[%372, %c0_108] : memref<64x128xf32, #tpu.memory_space<vmem>>, vector<8x128xf32>
    %cst_109 = arith.constant dense<0.000000e+00> : vector<8x128xf32>
    %374 = tpu.matmul %365, %297, %cst_109 {dimension_numbers = #tpu.dot_dimension_numbers<[1], [0], [0], [1], [0, 0, 1, 1], [], []>} : vector<8x32xf32>, vector<32x128xf32>, vector<8x128xf32> -> vector<8x128xf32>
    %375 = arith.addf %373, %374 : vector<8x128xf32>
    %376 = vector.extract_strided_slice %375 {offsets = [0, 0], sizes = [8, 32], strides = [1, 1]} : vector<8x128xf32> to vector<8x32xf32>
    %377 = arith.negf %376 : vector<8x32xf32>
    %378 = math.exp %377 : vector<8x32xf32>
    %cst_110 = arith.constant 1.000000e+00 : f32
    %379 = vector.broadcast %cst_110 : f32 to vector<8x32xf32>
    %380 = arith.addf %379, %378 : vector<8x32xf32>
    %381 = arith.divf %379, %380 : vector<8x32xf32>
    %382 = vector.extract_strided_slice %375 {offsets = [0, 32], sizes = [8, 32], strides = [1, 1]} : vector<8x128xf32> to vector<8x32xf32>
    %383 = arith.negf %382 : vector<8x32xf32>
    %384 = math.exp %383 : vector<8x32xf32>
    %cst_111 = arith.constant 1.000000e+00 : f32
    %385 = vector.broadcast %cst_111 : f32 to vector<8x32xf32>
    %386 = arith.addf %385, %384 : vector<8x32xf32>
    %387 = arith.divf %385, %386 : vector<8x32xf32>
    %388 = vector.extract_strided_slice %375 {offsets = [0, 64], sizes = [8, 32], strides = [1, 1]} : vector<8x128xf32> to vector<8x32xf32>
    %389 = math.tanh %388 : vector<8x32xf32>
    %390 = vector.extract_strided_slice %375 {offsets = [0, 96], sizes = [8, 32], strides = [1, 1]} : vector<8x128xf32> to vector<8x32xf32>
    %391 = arith.negf %390 : vector<8x32xf32>
    %392 = math.exp %391 : vector<8x32xf32>
    %cst_112 = arith.constant 1.000000e+00 : f32
    %393 = vector.broadcast %cst_112 : f32 to vector<8x32xf32>
    %394 = arith.addf %393, %392 : vector<8x32xf32>
    %395 = arith.divf %393, %394 : vector<8x32xf32>
    %396 = arith.mulf %387, %363 : vector<8x32xf32>
    %397 = arith.mulf %381, %389 : vector<8x32xf32>
    %398 = arith.addf %396, %397 : vector<8x32xf32>
    %399 = math.tanh %398 : vector<8x32xf32>
    %400 = arith.mulf %395, %399 : vector<8x32xf32>
    %c8_i32_113 = arith.constant 8 : i32
    %401 = arith.muli %c2_i32_106, %c8_i32_113 : i32
    %402 = tpu.assume_multiple %401, 8 : i32
    %403 = arith.index_cast %402 : i32 to index
    %c0_114 = arith.constant 0 : index
    %404 = vector.load %arg10[%403, %c0_114] : memref<64x32xf32, #tpu.memory_space<vmem>>, vector<8x32xf32>
    tpu.vector_store %arg10[%403, %c0_114], %400 {strides = array<i32>} : memref<64x32xf32, #tpu.memory_space<vmem>>, vector<8x32xf32>,
    %c3_i32_115 = arith.constant 3 : i32
    %c8_i32_116 = arith.constant 8 : i32
    %405 = arith.muli %c3_i32_115, %c8_i32_116 : i32
    %406 = tpu.assume_multiple %405, 8 : i32
    %407 = arith.index_cast %406 : i32 to index
    %c0_117 = arith.constant 0 : index
    %408 = vector.load %arg11[%407, %c0_117] : memref<64x128xf32, #tpu.memory_space<vmem>>, vector<8x128xf32>
    %cst_118 = arith.constant dense<0.000000e+00> : vector<8x128xf32>
    %409 = tpu.matmul %400, %297, %cst_118 {dimension_numbers = #tpu.dot_dimension_numbers<[1], [0], [0], [1], [0, 0, 1, 1], [], []>} : vector<8x32xf32>, vector<32x128xf32>, vector<8x128xf32> -> vector<8x128xf32>
    %410 = arith.addf %408, %409 : vector<8x128xf32>
    %411 = vector.extract_strided_slice %410 {offsets = [0, 0], sizes = [8, 32], strides = [1, 1]} : vector<8x128xf32> to vector<8x32xf32>
    %412 = arith.negf %411 : vector<8x32xf32>
    %413 = math.exp %412 : vector<8x32xf32>
    %cst_119 = arith.constant 1.000000e+00 : f32
    %414 = vector.broadcast %cst_119 : f32 to vector<8x32xf32>
    %415 = arith.addf %414, %413 : vector<8x32xf32>
    %416 = arith.divf %414, %415 : vector<8x32xf32>
    %417 = vector.extract_strided_slice %410 {offsets = [0, 32], sizes = [8, 32], strides = [1, 1]} : vector<8x128xf32> to vector<8x32xf32>
    %418 = arith.negf %417 : vector<8x32xf32>
    %419 = math.exp %418 : vector<8x32xf32>
    %cst_120 = arith.constant 1.000000e+00 : f32
    %420 = vector.broadcast %cst_120 : f32 to vector<8x32xf32>
    %421 = arith.addf %420, %419 : vector<8x32xf32>
    %422 = arith.divf %420, %421 : vector<8x32xf32>
    %423 = vector.extract_strided_slice %410 {offsets = [0, 64], sizes = [8, 32], strides = [1, 1]} : vector<8x128xf32> to vector<8x32xf32>
    %424 = math.tanh %423 : vector<8x32xf32>
    %425 = vector.extract_strided_slice %410 {offsets = [0, 96], sizes = [8, 32], strides = [1, 1]} : vector<8x128xf32> to vector<8x32xf32>
    %426 = arith.negf %425 : vector<8x32xf32>
    %427 = math.exp %426 : vector<8x32xf32>
    %cst_121 = arith.constant 1.000000e+00 : f32
    %428 = vector.broadcast %cst_121 : f32 to vector<8x32xf32>
    %429 = arith.addf %428, %427 : vector<8x32xf32>
    %430 = arith.divf %428, %429 : vector<8x32xf32>
    %431 = arith.mulf %422, %398 : vector<8x32xf32>
    %432 = arith.mulf %416, %424 : vector<8x32xf32>
    %433 = arith.addf %431, %432 : vector<8x32xf32>
    %434 = math.tanh %433 : vector<8x32xf32>
    %435 = arith.mulf %430, %434 : vector<8x32xf32>
    %c8_i32_122 = arith.constant 8 : i32
    %436 = arith.muli %c3_i32_115, %c8_i32_122 : i32
    %437 = tpu.assume_multiple %436, 8 : i32
    %438 = arith.index_cast %437 : i32 to index
    %c0_123 = arith.constant 0 : index
    %439 = vector.load %arg10[%438, %c0_123] : memref<64x32xf32, #tpu.memory_space<vmem>>, vector<8x32xf32>
    tpu.vector_store %arg10[%438, %c0_123], %435 {strides = array<i32>} : memref<64x32xf32, #tpu.memory_space<vmem>>, vector<8x32xf32>,
    %c4_i32_124 = arith.constant 4 : i32
    %c8_i32_125 = arith.constant 8 : i32
    %440 = arith.muli %c4_i32_124, %c8_i32_125 : i32
    %441 = tpu.assume_multiple %440, 8 : i32
    %442 = arith.index_cast %441 : i32 to index
    %c0_126 = arith.constant 0 : index
    %443 = vector.load %arg11[%442, %c0_126] : memref<64x128xf32, #tpu.memory_space<vmem>>, vector<8x128xf32>
    %cst_127 = arith.constant dense<0.000000e+00> : vector<8x128xf32>
    %444 = tpu.matmul %435, %297, %cst_127 {dimension_numbers = #tpu.dot_dimension_numbers<[1], [0], [0], [1], [0, 0, 1, 1], [], []>} : vector<8x32xf32>, vector<32x128xf32>, vector<8x128xf32> -> vector<8x128xf32>
    %445 = arith.addf %443, %444 : vector<8x128xf32>
    %446 = vector.extract_strided_slice %445 {offsets = [0, 0], sizes = [8, 32], strides = [1, 1]} : vector<8x128xf32> to vector<8x32xf32>
    %447 = arith.negf %446 : vector<8x32xf32>
    %448 = math.exp %447 : vector<8x32xf32>
    %cst_128 = arith.constant 1.000000e+00 : f32
    %449 = vector.broadcast %cst_128 : f32 to vector<8x32xf32>
    %450 = arith.addf %449, %448 : vector<8x32xf32>
    %451 = arith.divf %449, %450 : vector<8x32xf32>
    %452 = vector.extract_strided_slice %445 {offsets = [0, 32], sizes = [8, 32], strides = [1, 1]} : vector<8x128xf32> to vector<8x32xf32>
    %453 = arith.negf %452 : vector<8x32xf32>
    %454 = math.exp %453 : vector<8x32xf32>
    %cst_129 = arith.constant 1.000000e+00 : f32
    %455 = vector.broadcast %cst_129 : f32 to vector<8x32xf32>
    %456 = arith.addf %455, %454 : vector<8x32xf32>
    %457 = arith.divf %455, %456 : vector<8x32xf32>
    %458 = vector.extract_strided_slice %445 {offsets = [0, 64], sizes = [8, 32], strides = [1, 1]} : vector<8x128xf32> to vector<8x32xf32>
    %459 = math.tanh %458 : vector<8x32xf32>
    %460 = vector.extract_strided_slice %445 {offsets = [0, 96], sizes = [8, 32], strides = [1, 1]} : vector<8x128xf32> to vector<8x32xf32>
    %461 = arith.negf %460 : vector<8x32xf32>
    %462 = math.exp %461 : vector<8x32xf32>
    %cst_130 = arith.constant 1.000000e+00 : f32
    %463 = vector.broadcast %cst_130 : f32 to vector<8x32xf32>
    %464 = arith.addf %463, %462 : vector<8x32xf32>
    %465 = arith.divf %463, %464 : vector<8x32xf32>
    %466 = arith.mulf %457, %433 : vector<8x32xf32>
    %467 = arith.mulf %451, %459 : vector<8x32xf32>
    %468 = arith.addf %466, %467 : vector<8x32xf32>
    %469 = math.tanh %468 : vector<8x32xf32>
    %470 = arith.mulf %465, %469 : vector<8x32xf32>
    %c8_i32_131 = arith.constant 8 : i32
    %471 = arith.muli %c4_i32_124, %c8_i32_131 : i32
    %472 = tpu.assume_multiple %471, 8 : i32
    %473 = arith.index_cast %472 : i32 to index
    %c0_132 = arith.constant 0 : index
    %474 = vector.load %arg10[%473, %c0_132] : memref<64x32xf32, #tpu.memory_space<vmem>>, vector<8x32xf32>
    tpu.vector_store %arg10[%473, %c0_132], %470 {strides = array<i32>} : memref<64x32xf32, #tpu.memory_space<vmem>>, vector<8x32xf32>,
    %c5_i32_133 = arith.constant 5 : i32
    %c8_i32_134 = arith.constant 8 : i32
    %475 = arith.muli %c5_i32_133, %c8_i32_134 : i32
    %476 = tpu.assume_multiple %475, 8 : i32
    %477 = arith.index_cast %476 : i32 to index
    %c0_135 = arith.constant 0 : index
    %478 = vector.load %arg11[%477, %c0_135] : memref<64x128xf32, #tpu.memory_space<vmem>>, vector<8x128xf32>
    %cst_136 = arith.constant dense<0.000000e+00> : vector<8x128xf32>
    %479 = tpu.matmul %470, %297, %cst_136 {dimension_numbers = #tpu.dot_dimension_numbers<[1], [0], [0], [1], [0, 0, 1, 1], [], []>} : vector<8x32xf32>, vector<32x128xf32>, vector<8x128xf32> -> vector<8x128xf32>
    %480 = arith.addf %478, %479 : vector<8x128xf32>
    %481 = vector.extract_strided_slice %480 {offsets = [0, 0], sizes = [8, 32], strides = [1, 1]} : vector<8x128xf32> to vector<8x32xf32>
    %482 = arith.negf %481 : vector<8x32xf32>
    %483 = math.exp %482 : vector<8x32xf32>
    %cst_137 = arith.constant 1.000000e+00 : f32
    %484 = vector.broadcast %cst_137 : f32 to vector<8x32xf32>
    %485 = arith.addf %484, %483 : vector<8x32xf32>
    %486 = arith.divf %484, %485 : vector<8x32xf32>
    %487 = vector.extract_strided_slice %480 {offsets = [0, 32], sizes = [8, 32], strides = [1, 1]} : vector<8x128xf32> to vector<8x32xf32>
    %488 = arith.negf %487 : vector<8x32xf32>
    %489 = math.exp %488 : vector<8x32xf32>
    %cst_138 = arith.constant 1.000000e+00 : f32
    %490 = vector.broadcast %cst_138 : f32 to vector<8x32xf32>
    %491 = arith.addf %490, %489 : vector<8x32xf32>
    %492 = arith.divf %490, %491 : vector<8x32xf32>
    %493 = vector.extract_strided_slice %480 {offsets = [0, 64], sizes = [8, 32], strides = [1, 1]} : vector<8x128xf32> to vector<8x32xf32>
    %494 = math.tanh %493 : vector<8x32xf32>
    %495 = vector.extract_strided_slice %480 {offsets = [0, 96], sizes = [8, 32], strides = [1, 1]} : vector<8x128xf32> to vector<8x32xf32>
    %496 = arith.negf %495 : vector<8x32xf32>
    %497 = math.exp %496 : vector<8x32xf32>
    %cst_139 = arith.constant 1.000000e+00 : f32
    %498 = vector.broadcast %cst_139 : f32 to vector<8x32xf32>
    %499 = arith.addf %498, %497 : vector<8x32xf32>
    %500 = arith.divf %498, %499 : vector<8x32xf32>
    %501 = arith.mulf %492, %468 : vector<8x32xf32>
    %502 = arith.mulf %486, %494 : vector<8x32xf32>
    %503 = arith.addf %501, %502 : vector<8x32xf32>
    %504 = math.tanh %503 : vector<8x32xf32>
    %505 = arith.mulf %500, %504 : vector<8x32xf32>
    %c8_i32_140 = arith.constant 8 : i32
    %506 = arith.muli %c5_i32_133, %c8_i32_140 : i32
    %507 = tpu.assume_multiple %506, 8 : i32
    %508 = arith.index_cast %507 : i32 to index
    %c0_141 = arith.constant 0 : index
    %509 = vector.load %arg10[%508, %c0_141] : memref<64x32xf32, #tpu.memory_space<vmem>>, vector<8x32xf32>
    tpu.vector_store %arg10[%508, %c0_141], %505 {strides = array<i32>} : memref<64x32xf32, #tpu.memory_space<vmem>>, vector<8x32xf32>,
    %c6_i32_142 = arith.constant 6 : i32
    %c8_i32_143 = arith.constant 8 : i32
    %510 = arith.muli %c6_i32_142, %c8_i32_143 : i32
    %511 = tpu.assume_multiple %510, 8 : i32
    %512 = arith.index_cast %511 : i32 to index
    %c0_144 = arith.constant 0 : index
    %513 = vector.load %arg11[%512, %c0_144] : memref<64x128xf32, #tpu.memory_space<vmem>>, vector<8x128xf32>
    %cst_145 = arith.constant dense<0.000000e+00> : vector<8x128xf32>
    %514 = tpu.matmul %505, %297, %cst_145 {dimension_numbers = #tpu.dot_dimension_numbers<[1], [0], [0], [1], [0, 0, 1, 1], [], []>} : vector<8x32xf32>, vector<32x128xf32>, vector<8x128xf32> -> vector<8x128xf32>
    %515 = arith.addf %513, %514 : vector<8x128xf32>
    %516 = vector.extract_strided_slice %515 {offsets = [0, 0], sizes = [8, 32], strides = [1, 1]} : vector<8x128xf32> to vector<8x32xf32>
    %517 = arith.negf %516 : vector<8x32xf32>
    %518 = math.exp %517 : vector<8x32xf32>
    %cst_146 = arith.constant 1.000000e+00 : f32
    %519 = vector.broadcast %cst_146 : f32 to vector<8x32xf32>
    %520 = arith.addf %519, %518 : vector<8x32xf32>
    %521 = arith.divf %519, %520 : vector<8x32xf32>
    %522 = vector.extract_strided_slice %515 {offsets = [0, 32], sizes = [8, 32], strides = [1, 1]} : vector<8x128xf32> to vector<8x32xf32>
    %523 = arith.negf %522 : vector<8x32xf32>
    %524 = math.exp %523 : vector<8x32xf32>
    %cst_147 = arith.constant 1.000000e+00 : f32
    %525 = vector.broadcast %cst_147 : f32 to vector<8x32xf32>
    %526 = arith.addf %525, %524 : vector<8x32xf32>
    %527 = arith.divf %525, %526 : vector<8x32xf32>
    %528 = vector.extract_strided_slice %515 {offsets = [0, 64], sizes = [8, 32], strides = [1, 1]} : vector<8x128xf32> to vector<8x32xf32>
    %529 = math.tanh %528 : vector<8x32xf32>
    %530 = vector.extract_strided_slice %515 {offsets = [0, 96], sizes = [8, 32], strides = [1, 1]} : vector<8x128xf32> to vector<8x32xf32>
    %531 = arith.negf %530 : vector<8x32xf32>
    %532 = math.exp %531 : vector<8x32xf32>
    %cst_148 = arith.constant 1.000000e+00 : f32
    %533 = vector.broadcast %cst_148 : f32 to vector<8x32xf32>
    %534 = arith.addf %533, %532 : vector<8x32xf32>
    %535 = arith.divf %533, %534 : vector<8x32xf32>
    %536 = arith.mulf %527, %503 : vector<8x32xf32>
    %537 = arith.mulf %521, %529 : vector<8x32xf32>
    %538 = arith.addf %536, %537 : vector<8x32xf32>
    %539 = math.tanh %538 : vector<8x32xf32>
    %540 = arith.mulf %535, %539 : vector<8x32xf32>
    %c8_i32_149 = arith.constant 8 : i32
    %541 = arith.muli %c6_i32_142, %c8_i32_149 : i32
    %542 = tpu.assume_multiple %541, 8 : i32
    %543 = arith.index_cast %542 : i32 to index
    %c0_150 = arith.constant 0 : index
    %544 = vector.load %arg10[%543, %c0_150] : memref<64x32xf32, #tpu.memory_space<vmem>>, vector<8x32xf32>
    tpu.vector_store %arg10[%543, %c0_150], %540 {strides = array<i32>} : memref<64x32xf32, #tpu.memory_space<vmem>>, vector<8x32xf32>,
    %c7_i32_151 = arith.constant 7 : i32
    %c8_i32_152 = arith.constant 8 : i32
    %545 = arith.muli %c7_i32_151, %c8_i32_152 : i32
    %546 = tpu.assume_multiple %545, 8 : i32
    %547 = arith.index_cast %546 : i32 to index
    %c0_153 = arith.constant 0 : index
    %548 = vector.load %arg11[%547, %c0_153] : memref<64x128xf32, #tpu.memory_space<vmem>>, vector<8x128xf32>
    %cst_154 = arith.constant dense<0.000000e+00> : vector<8x128xf32>
    %549 = tpu.matmul %540, %297, %cst_154 {dimension_numbers = #tpu.dot_dimension_numbers<[1], [0], [0], [1], [0, 0, 1, 1], [], []>} : vector<8x32xf32>, vector<32x128xf32>, vector<8x128xf32> -> vector<8x128xf32>
    %550 = arith.addf %548, %549 : vector<8x128xf32>
    %551 = vector.extract_strided_slice %550 {offsets = [0, 0], sizes = [8, 32], strides = [1, 1]} : vector<8x128xf32> to vector<8x32xf32>
    %552 = arith.negf %551 : vector<8x32xf32>
    %553 = math.exp %552 : vector<8x32xf32>
    %cst_155 = arith.constant 1.000000e+00 : f32
    %554 = vector.broadcast %cst_155 : f32 to vector<8x32xf32>
    %555 = arith.addf %554, %553 : vector<8x32xf32>
    %556 = arith.divf %554, %555 : vector<8x32xf32>
    %557 = vector.extract_strided_slice %550 {offsets = [0, 32], sizes = [8, 32], strides = [1, 1]} : vector<8x128xf32> to vector<8x32xf32>
    %558 = arith.negf %557 : vector<8x32xf32>
    %559 = math.exp %558 : vector<8x32xf32>
    %cst_156 = arith.constant 1.000000e+00 : f32
    %560 = vector.broadcast %cst_156 : f32 to vector<8x32xf32>
    %561 = arith.addf %560, %559 : vector<8x32xf32>
    %562 = arith.divf %560, %561 : vector<8x32xf32>
    %563 = vector.extract_strided_slice %550 {offsets = [0, 64], sizes = [8, 32], strides = [1, 1]} : vector<8x128xf32> to vector<8x32xf32>
    %564 = math.tanh %563 : vector<8x32xf32>
    %565 = vector.extract_strided_slice %550 {offsets = [0, 96], sizes = [8, 32], strides = [1, 1]} : vector<8x128xf32> to vector<8x32xf32>
    %566 = arith.negf %565 : vector<8x32xf32>
    %567 = math.exp %566 : vector<8x32xf32>
    %cst_157 = arith.constant 1.000000e+00 : f32
    %568 = vector.broadcast %cst_157 : f32 to vector<8x32xf32>
    %569 = arith.addf %568, %567 : vector<8x32xf32>
    %570 = arith.divf %568, %569 : vector<8x32xf32>
    %571 = arith.mulf %562, %538 : vector<8x32xf32>
    %572 = arith.mulf %556, %564 : vector<8x32xf32>
    %573 = arith.addf %571, %572 : vector<8x32xf32>
    %574 = math.tanh %573 : vector<8x32xf32>
    %575 = arith.mulf %570, %574 : vector<8x32xf32>
    %c8_i32_158 = arith.constant 8 : i32
    %576 = arith.muli %c7_i32_151, %c8_i32_158 : i32
    %577 = tpu.assume_multiple %576, 8 : i32
    %578 = arith.index_cast %577 : i32 to index
    %c0_159 = arith.constant 0 : index
    %579 = vector.load %arg10[%578, %c0_159] : memref<64x32xf32, #tpu.memory_space<vmem>>, vector<8x32xf32>
    tpu.vector_store %arg10[%578, %c0_159], %575 {strides = array<i32>} : memref<64x32xf32, #tpu.memory_space<vmem>>, vector<8x32xf32>,
    %c8_i32_160 = arith.constant 8 : i32
    %c0_161 = arith.constant 0 : index
    %c0_162 = arith.constant 0 : index
    %580 = vector.load %arg10[%c0_161, %c0_162] : memref<64x32xf32, #tpu.memory_space<vmem>>, vector<64x32xf32>
    %c0_163 = arith.constant 0 : index
    %c0_164 = arith.constant 0 : index
    %581 = vector.load %arg7[%c0_163, %c0_164] : memref<32x128xf32, #tpu.memory_space<vmem>>, vector<32x128xf32>
    %cst_165 = arith.constant dense<0.000000e+00> : vector<64x128xf32>
    %582 = tpu.matmul %580, %581, %cst_165 {dimension_numbers = #tpu.dot_dimension_numbers<[1], [0], [0], [1], [0, 0, 1, 1], [], []>} : vector<64x32xf32>, vector<32x128xf32>, vector<64x128xf32> -> vector<64x128xf32>
    %c0_166 = arith.constant 0 : index
    %c0_167 = arith.constant 0 : index
    %583 = vector.load %arg8[%c0_166, %c0_167] : memref<1x128xf32, #tpu.memory_space<vmem>>, vector<1x128xf32>
    %584 = vector.broadcast %583 : vector<1x128xf32> to vector<64x128xf32>
    %585 = arith.addf %582, %584 : vector<64x128xf32>
    %c0_168 = arith.constant 0 : index
    %c0_169 = arith.constant 0 : index
    %586 = vector.load %arg9[%c0_168, %c0_169] : memref<64x128xf32, #tpu.memory_space<vmem>>, vector<64x128xf32>
    tpu.vector_store %arg9[%c0_168, %c0_169], %585 {strides = array<i32>} : memref<64x128xf32, #tpu.memory_space<vmem>>, vector<64x128xf32>,
    return
  }
}

</mosaic_0001>

<bundles_post_ra>
// kernel: tpu_custom_call.1
= control target key start
LH: loop header
LB: loop body
LE: loop exit
PB: predicated region body
PF: predicated region fallthrough
CT: control target
= control target key end

     0   :  { %14 = vsyncpa [#allocation5], 0  ;;  %s2117_s0 = inlined_call_operand.vmem [shape: f32[64,16], index: 0, kind: input, shape index: {}]   ;;  %s2118_s1 = inlined_call_operand.vmem [shape: f32[16,128], index: 1, kind: input, shape index: {}]   ;;  %s2119_s2 = inlined_call_operand.vmem [shape: f32[32,128], index: 2, kind: input, shape index: {}]   ;;  %s2120_s3 = inlined_call_operand.vmem [shape: f32[1,128], index: 3, kind: input, shape index: {}]   ;;  %s2121_s4 = inlined_call_operand.vmem [shape: f32[32,128], index: 4, kind: input, shape index: {}]   ;;  %s2122_s5 = inlined_call_operand.hbm [shape: f32[32,128], index: 5, kind: input, shape index: {}]   ;;  %s2123_s6 = inlined_call_operand.vmem [shape: f32[1,128], index: 6, kind: input, shape index: {}]   ;;  %s2124_s7 = inlined_call_operand.hbm [shape: f32[32,128], index: 7, kind: input, shape index: {}]   ;;  %s2125_s8 = inlined_call_operand.vmem [shape: f32[1,128], index: 8, kind: input, shape index: {}]   ;;  %s2126_s9 = inlined_call_operand.hbm [shape: f32[64,128], index: 9, kind: output, shape index: {}]  }
   0x1   :  { %15 = vsyncpa [#allocation8], 0 }
   0x2   :  { %16 = vsyncpa [#allocation6], 0  ;;  %s31_s11 = sshll.u32 %s2122_s5, 4  ;;  %s1708_s12 = smov [#allocation4]   ;;  %s32_s11 = int_to_ptr.hbm [resolvable:$true] %s31_s11 }
   0x3   :  { %s33_s13 = sshll.u32 %s1708_s12, 4  ;;  %s46_s16 = sshll.u32 %s2124_s7, 4  ;;  %s34_s13 = int_to_ptr.vmem [resolvable:$true] %s33_s13  ;;  %s47_s16 = int_to_ptr.hbm [resolvable:$true] %s46_s16 }
   0x4   :  { %s1709_s17 = smov 128   ;;  %s1710_s18 = smov 8  }
   0x5   :  { %39 = dma.hbm_to_vmem [thread:$0]  %s32_s11, 512, %s34_s13, [#allocation5], %s1709_s17, %s1709_s17, %s1710_s18  }
   0x6   :  { %s1711_s19 = smov [#allocation7]  }
   0x7   :  { %s48_s20 = sshll.u32 %s1711_s19, 4  ;;  %s49_s20 = int_to_ptr.vmem [resolvable:$true] %s48_s20 }
   0x8   :  { %54 = dma.hbm_to_vmem [thread:$0]  %s47_s16, 512, %s49_s20, [#allocation8], %s1709_s17, %s1709_s17, %s1710_s18  }
   0x9   :  { %1702 = dma.done.wait [#allocation5], 512  }
   0xa   :  { %1703 = vsyncadd [#allocation5], 4294966784 }
   0xb   :  { %1704 = dma.done.wait [#allocation8], 512  }
   0xc   :  { %1705 = vsyncadd [#allocation8], 4294966784  ;;  %v1781_v0 = vld [vmem:[%s2119_s2 + $0x18] sm:$0xff]  ;;  %v74_v1 = vld [vmem:[%s2118_s1 + $0x8] sm:$0xff]  ;;  %vm79_vm0 = vcmask 130048   ;;  %v1712_v7 = vmov 0.0  }
   0xd   :  { %v1789_v2 = vld [vmem:[%s2119_s2 + $0x10] sm:$0xff]  ;;  %174 = vmatpush.msra.mxu1 %v1781_v0  ;;  %118 = vmatpush.msra.mxu0 %v74_v1  ;;  %v73_v3 = vld [vmem:[%s2118_s1] sm:$0xff]  ;;  %v1801_v5 = vld [vmem:[%s2119_s2 + $0x8] sm:$0xff]  ;;  %s1713_s12 = smov 64   ;;  %vm158_vm5 = vcmask 261120   ;;  %s1415_s19 = sshll.u32 %s2126_s9, 4  ;;  %s1416_s19 = int_to_ptr.hbm [resolvable:$true] %s1415_s19 }
   0xe   :  { %v65_v4 = vld [vmem:[%s2117_s0] sm:$0xff]  ;;  %241 = vmatpush.msra.mxu2 %v1781_v0  ;;  %309 = vmatpush.msra.mxu3 %v1781_v0  ;;  %v66_v35 = vld [vmem:[%s2117_s0 + $0x8] sm:$0xff]  ;;  %v67_v63 = vld [vmem:[%s2117_s0 + $0x10] sm:$0xff] }
   0xf   :  { %175 = vmatpush.msra.mxu1 %v1789_v2  ;;  %119 = vmatpush.msra.mxu0 %v73_v3  ;;  %v1810_v6 = vld [vmem:[%s2119_s2] sm:$0xff] }
  0x10   :  { %1429 = vmatmul.msk.f32.vlgmr.msra.gmra.mxu0 %vm79_vm0, %v65_v4  ;;  %242 = vmatpush.msra.mxu2 %v1789_v2  ;;  %v1840_v8 = vld [vmem:[%s2120_s3] ss:$0 sm:$0xff]  ;;  %s1714_s3 = smov 32  }
  0x11   :  { %176 = vmatpush.msra.mxu1 %v1801_v5  ;;  %310 = vmatpush.msra.mxu3 %v1789_v2 }
  0x12   :  { %243 = vmatpush.msra.mxu2 %v1801_v5 }
  0x13   :  { %177 = vmatpush.msra.mxu1 %v1810_v6  ;;  %311 = vmatpush.msra.mxu3 %v1801_v5 }
  0x14   :  { %178 = vmatmul.f32.vlgmr.msra.gmra.mxu1 %v1712_v7  ;;  %244 = vmatpush.msra.mxu2 %v1810_v6 }
  0x15   :  { %312 = vmatpush.msra.mxu3 %v1810_v6  ;;  %377 = vmatpush.msrb.mxu1 %v1781_v0 }
  0x16   :  { %445 = vmatpush.msrb.mxu2 %v1781_v0 }
  0x17   :  { %513 = vmatpush.msrb.mxu3 %v1781_v0  ;;  %378 = vmatpush.msrb.mxu1 %v1789_v2 }
  0x18   :  { %446 = vmatpush.msrb.mxu2 %v1789_v2  ;;  %1430 = vmatmul.msk.f32.gmra.mxu0 %vm79_vm0, %v66_v35 }
  0x19   :  { %514 = vmatpush.msrb.mxu3 %v1789_v2  ;;  %379 = vmatpush.msrb.mxu1 %v1801_v5 }
  0x1a   :  { %447 = vmatpush.msrb.mxu2 %v1801_v5 }
  0x1b   :  { %515 = vmatpush.msrb.mxu3 %v1801_v5  ;;  %380 = vmatpush.msrb.mxu1 %v1810_v6 }
  0x1c   :  { %448 = vmatpush.msrb.mxu2 %v1810_v6 }
  0x1d   :  { %516 = vmatpush.msrb.mxu3 %v1810_v6  ;;  %581 = vmatpush.msra.mxu1 %v1781_v0 }
  0x1f   :  { %582 = vmatpush.msra.mxu1 %v1789_v2 }
  0x20   :  { %1431 = vmatmul.msk.f32.gmra.mxu0 %vm79_vm0, %v67_v63 }
  0x21   :  { %583 = vmatpush.msra.mxu1 %v1801_v5 }
  0x23   :  { %584 = vmatpush.msra.mxu1 %v1810_v6 }
  0x8d   :  { %v121_v9 = vpop.f32.mrf.mxu0 }
  0x8e   :  { %v122_v10 = vadd.f32 %v1840_v8, %v121_v9 }
  0x91   :  { %v179_v11 = vpop.f32.mrf.mxu1 }
  0x92   :  { %v182_v12 = vadd.f32 %v179_v11, %v122_v10 }
  0x94   :  { %1502 = vtanh.f32 %v182_v12  ;;  %v1437_v14 = vmul.f32 -1.442695, %v182_v12 }
  0x95   :  { %v124_v37 = vpop.f32.mrf.mxu0 }
  0x96   :  { %1504 = vpow2.f32 %v1437_v14  ;;  %v125_v38 = vadd.f32 %v1840_v8, %v124_v37 }
  0x9a   :  { %v1503_v13 = vpop.eup %1502 }
  0x9b   :  { %205 = vrot.lane.b32.xlu0 %v1503_v13, %s1713_s12 }
  0x9c   :  { %v1505_v15 = vpop.eup %1504 }
  0x9d   :  { %v186_v16 = vadd.f32 1.0, %v1505_v15  ;;  %v127_v1 = vpop.f32.mrf.mxu0 }
  0x9f   :  { %1506 = vrcp.f32 %v186_v16  ;;  %v198_v22 = vand.u32 2147483648, %v186_v16  ;;  %vm192_vm2 = vweird.f32 %v186_v16  ;;  %v196_v23 = vand.u32 2147483647, %v186_v16 }
  0xa1   :  { %v199_v25 = vor.u32 1.1754944e-38, %v198_v22  ;;  %vm197_vm4 = vcmp.eq.f32.partialorder %v196_v23, 8.507059e+37 }
  0xa5   :  { %v1507_v17 = vpop.eup %1506 }
  0xa6   :  { %v188_v18 = vmul.f32 %v1507_v17, %v186_v16  ;;  %vm193_vm1 = vweird.f32 %v1507_v17 }
  0xa7   :  { %vm194_vm3 = vmor %vm192_vm2, %vm193_vm1 }
  0xa8   :  { %v189_v19 = vsub.f32 1.0, %v188_v18 }
  0xaa   :  { %v190_v20 = vmul.f32 %v1507_v17, %v189_v19 }
  0xac   :  { %v191_v21 = vadd.f32 %v1507_v17, %v190_v20 }
  0xae   :  { %v195_v24 = vsel %vm194_vm3, %v1507_v17, %v191_v21 }
  0xaf   :  { %v200_v27 = vsel %vm197_vm4, %v199_v25, %v195_v24 }
  0xb0   :  { %v203_v29 = vmul.f32 0.0, %v200_v27 }
 0x10d   :  { %v206_v26 = vpop.permute.xlu0 %205 }
 0x10e   :  { %v208_v28 = vmul.f32 %v206_v26, %v200_v27 }
 0x110   :  { %210 = vrot.lane.b32.xlu0 %v208_v28, %s1714_s3 }
 0x182   :  { %v211_v30 = vpop.permute.xlu0 %210 }
 0x183   :  { %v213_v31 = vadd.f32 %v211_v30, %v203_v29 }
 0x185   :  { %1508 = vtanh.f32 %v213_v31 }
 0x18b   :  { %v1509_v32 = vpop.eup %1508 }
 0x18c   :  { %216 = vrot.lane.b32.xlu1 %v1509_v32, %s1713_s12 }
 0x1fe   :  { %v217_v33 = vpop.permute.xlu1 %216 }
 0x1ff   :  { %v219_v34 = vmul.f32 %v217_v33, %v200_v27  ;;  %v68_v27 = vld [vmem:[%s2117_s0 + $0x18] sm:$0xff] }
 0x200   :  { %1432 = vmatmul.msk.f32.gmra.mxu0 %vm79_vm0, %v68_v27  ;;  %v709_v27 = vld [vmem:[%s2121_s4] sm:$0xff] }
 0x201   :  { %221 = vrot.lane.b32.xlu1 %v219_v34, %s1714_s3 }
 0x273   :  { %v222_v36 = vpop.permute.xlu1 %221 }
 0x274   :  { %224 = vst.msk [vmem:[#allocation2] sm:$0xff] %vm158_vm5, %v222_v36  ;;  %1438 = vmatmul.msk.f32.vlgmr.msra.gmra.mxu2 %vm158_vm5, %v222_v36 }
 0x275   :  { %649 = vmatpush.msra.mxu2 %v1781_v0 }
 0x277   :  { %650 = vmatpush.msra.mxu2 %v1789_v2  ;;  %v128_v2 = vadd.f32 %v1840_v8, %v127_v1 }
 0x279   :  { %651 = vmatpush.msra.mxu2 %v1801_v5 }
 0x27b   :  { %652 = vmatpush.msra.mxu2 %v1810_v6 }
 0x2f7   :  { %v246_v39 = vpop.f32.mrf.mxu2 }
 0x2f8   :  { %v249_v40 = vadd.f32 %v246_v39, %v125_v38 }
 0x2fa   :  { %1510 = vtanh.f32 %v249_v40  ;;  %v1439_v42 = vmul.f32 -1.442695, %v249_v40 }
 0x2fc   :  { %1512 = vpow2.f32 %v1439_v42 }
 0x300   :  { %v1511_v41 = vpop.eup %1510 }
 0x301   :  { %272 = vrot.lane.b32.xlu2 %v1511_v41, %s1713_s12 }
 0x302   :  { %v1513_v43 = vpop.eup %1512 }
 0x303   :  { %v253_v44 = vadd.f32 1.0, %v1513_v43 }
 0x305   :  { %1514 = vrcp.f32 %v253_v44  ;;  %v265_v50 = vand.u32 2147483648, %v253_v44  ;;  %vm259_vm7 = vweird.f32 %v253_v44  ;;  %v263_v51 = vand.u32 2147483647, %v253_v44 }
 0x307   :  { %v266_v53 = vor.u32 1.1754944e-38, %v265_v50  ;;  %vm264_vm9 = vcmp.eq.f32.partialorder %v263_v51, 8.507059e+37 }
 0x30b   :  { %v1515_v45 = vpop.eup %1514 }
 0x30c   :  { %v255_v46 = vmul.f32 %v1515_v45, %v253_v44  ;;  %vm260_vm6 = vweird.f32 %v1515_v45 }
 0x30d   :  { %vm261_vm8 = vmor %vm259_vm7, %vm260_vm6 }
 0x30e   :  { %v256_v47 = vsub.f32 1.0, %v255_v46 }
 0x310   :  { %v257_v48 = vmul.f32 %v1515_v45, %v256_v47 }
 0x312   :  { %v258_v49 = vadd.f32 %v1515_v45, %v257_v48 }
 0x314   :  { %v262_v52 = vsel %vm261_vm8, %v1515_v45, %v258_v49 }
 0x315   :  { %v267_v55 = vsel %vm264_vm9, %v266_v53, %v262_v52 }
 0x316   :  { %v270_v57 = vmul.f32 %v267_v55, %v213_v31  ;;  %v130_v31 = vpop.f32.mrf.mxu0 }
 0x317   :  { %v131_v32 = vadd.f32 %v1840_v8, %v130_v31 }
 0x35b   :  { %v273_v54 = vpop.permute.xlu2 %272 }
 0x35c   :  { %v275_v56 = vmul.f32 %v273_v54, %v267_v55 }
 0x35e   :  { %277 = vrot.lane.b32.xlu2 %v275_v56, %s1714_s3 }
 0x3b8   :  { %v278_v58 = vpop.permute.xlu2 %277 }
 0x3b9   :  { %v280_v59 = vadd.f32 %v278_v58, %v270_v57  ;;  %v69_v57 = vld [vmem:[%s2117_s0 + $0x20] sm:$0xff] }
 0x3ba   :  { %1433 = vmatmul.msk.f32.gmra.mxu0 %vm79_vm0, %v69_v57 }
 0x3bb   :  { %1516 = vtanh.f32 %v280_v59 }
 0x3c1   :  { %v1517_v60 = vpop.eup %1516 }
 0x3c2   :  { %283 = vrot.lane.b32.xlu0 %v1517_v60, %s1713_s12 }
 0x434   :  { %v284_v61 = vpop.permute.xlu0 %283 }
 0x435   :  { %v286_v62 = vmul.f32 %v284_v61, %v267_v55 }
 0x437   :  { %288 = vrot.lane.b32.xlu1 %v286_v62, %s1714_s3 }
 0x4a9   :  { %v289_v0 = vpop.permute.xlu1 %288 }
 0x4aa   :  { %292 = vst.msk [vmem:[#allocation2 + $0x8] sm:$0xff] %vm158_vm5, %v289_v0  ;;  %1440 = vmatmul.msk.f32.vlgmr.msra.gmra.mxu3 %vm158_vm5, %v289_v0 }
 0x52d   :  { %v314_v3 = vpop.f32.mrf.mxu3 }
 0x52e   :  { %v317_v4 = vadd.f32 %v314_v3, %v128_v2 }
 0x530   :  { %1518 = vtanh.f32 %v317_v4  ;;  %v1441_v6 = vmul.f32 -1.442695, %v317_v4 }
 0x532   :  { %1520 = vpow2.f32 %v1441_v6 }
 0x536   :  { %v1519_v5 = vpop.eup %1518 }
 0x537   :  { %340 = vrot.lane.b32.xlu2 %v1519_v5, %s1713_s12 }
 0x538   :  { %v1521_v9 = vpop.eup %1520 }
 0x539   :  { %v321_v10 = vadd.f32 1.0, %v1521_v9 }
 0x53b   :  { %1522 = vrcp.f32 %v321_v10  ;;  %v333_v16 = vand.u32 2147483648, %v321_v10  ;;  %vm327_vm11 = vweird.f32 %v321_v10  ;;  %v331_v17 = vand.u32 2147483647, %v321_v10 }
 0x53d   :  { %v334_v19 = vor.u32 1.1754944e-38, %v333_v16  ;;  %vm332_vm13 = vcmp.eq.f32.partialorder %v331_v17, 8.507059e+37 }
 0x541   :  { %v1523_v11 = vpop.eup %1522 }
 0x542   :  { %v323_v12 = vmul.f32 %v1523_v11, %v321_v10  ;;  %vm328_vm10 = vweird.f32 %v1523_v11 }
 0x543   :  { %vm329_vm12 = vmor %vm327_vm11, %vm328_vm10 }
 0x544   :  { %v324_v13 = vsub.f32 1.0, %v323_v12 }
 0x546   :  { %v325_v14 = vmul.f32 %v1523_v11, %v324_v13 }
 0x548   :  { %v326_v15 = vadd.f32 %v1523_v11, %v325_v14 }
 0x54a   :  { %v330_v18 = vsel %vm329_vm12, %v1523_v11, %v326_v15 }
 0x54b   :  { %v335_v21 = vsel %vm332_vm13, %v334_v19, %v330_v18 }
 0x54c   :  { %v338_v23 = vmul.f32 %v335_v21, %v280_v59  ;;  %v133_v59 = vpop.f32.mrf.mxu0 }
 0x54d   :  { %v134_v60 = vadd.f32 %v1840_v8, %v133_v59 }
 0x591   :  { %v341_v20 = vpop.permute.xlu2 %340 }
 0x592   :  { %v343_v22 = vmul.f32 %v341_v20, %v335_v21 }
 0x594   :  { %345 = vrot.lane.b32.xlu0 %v343_v22, %s1714_s3 }
 0x606   :  { %v346_v24 = vpop.permute.xlu0 %345 }
 0x607   :  { %v348_v25 = vadd.f32 %v346_v24, %v338_v23  ;;  %v712_v23 = vld [vmem:[%s2121_s4 + $0x18] sm:$0xff]  ;;  %v711_v24 = vld [vmem:[%s2121_s4 + $0x10] sm:$0xff] }
 0x608   :  { %753 = vmatpush.msra.mxu3 %v712_v23 }
 0x609   :  { %1524 = vtanh.f32 %v348_v25 }
 0x60a   :  { %754 = vmatpush.msra.mxu3 %v711_v24 }
 0x60f   :  { %v1525_v26 = vpop.eup %1524 }
 0x610   :  { %351 = vrot.lane.b32.xlu1 %v1525_v26, %s1713_s12  ;;  %v710_v26 = vld [vmem:[%s2121_s4 + $0x8] sm:$0xff] }
 0x611   :  { %755 = vmatpush.msra.mxu3 %v710_v26 }
 0x613   :  { %756 = vmatpush.msra.mxu3 %v709_v27 }
 0x682   :  { %v352_v28 = vpop.permute.xlu1 %351 }
 0x683   :  { %v354_v29 = vmul.f32 %v352_v28, %v335_v21 }
 0x685   :  { %356 = vrot.lane.b32.xlu2 %v354_v29, %s1714_s3  ;;  %v701_v29 = vld [vmem:[#allocation2] sm:$0xff] }
 0x6df   :  { %v357_v30 = vpop.permute.xlu2 %356 }
 0x6e0   :  { %360 = vst.msk [vmem:[#allocation2 + $0x10] sm:$0xff] %vm158_vm5, %v357_v30  ;;  %1442 = vmatmul.msk.f32.vlgmr.msrb.gmra.mxu1 %vm158_vm5, %v357_v30  ;;  %v702_v30 = vld [vmem:[#allocation2 + $0x8] sm:$0xff] }
 0x6e7   :  { %v703_v31 = vld [vmem:[#allocation2 + $0x10] sm:$0xff] }
 0x75d   :  { %v382_v33 = vpop.f32.mrf.mxu1 }
 0x75e   :  { %v385_v34 = vadd.f32 %v382_v33, %v131_v32 }
 0x760   :  { %1526 = vtanh.f32 %v385_v34  ;;  %v1443_v36 = vmul.f32 -1.442695, %v385_v34 }
 0x762   :  { %1528 = vpow2.f32 %v1443_v36 }
 0x766   :  { %v1527_v35 = vpop.eup %1526 }
 0x767   :  { %408 = vrot.lane.b32.xlu0 %v1527_v35, %s1713_s12 }
 0x768   :  { %v1529_v37 = vpop.eup %1528 }
 0x769   :  { %v389_v38 = vadd.f32 1.0, %v1529_v37 }
 0x76b   :  { %1530 = vrcp.f32 %v389_v38  ;;  %v401_v44 = vand.u32 2147483648, %v389_v38  ;;  %vm395_vm15 = vweird.f32 %v389_v38  ;;  %v399_v45 = vand.u32 2147483647, %v389_v38 }
 0x76d   :  { %v402_v47 = vor.u32 1.1754944e-38, %v401_v44  ;;  %vm400_vm2 = vcmp.eq.f32.partialorder %v399_v45, 8.507059e+37 }
 0x771   :  { %v1531_v39 = vpop.eup %1530 }
 0x772   :  { %v391_v40 = vmul.f32 %v1531_v39, %v389_v38  ;;  %vm396_vm14 = vweird.f32 %v1531_v39 }
 0x773   :  { %vm397_vm1 = vmor %vm395_vm15, %vm396_vm14 }
 0x774   :  { %v392_v41 = vsub.f32 1.0, %v391_v40 }
 0x776   :  { %v393_v42 = vmul.f32 %v1531_v39, %v392_v41 }
 0x778   :  { %v394_v43 = vadd.f32 %v1531_v39, %v393_v42 }
 0x77a   :  { %v398_v46 = vsel %vm397_vm1, %v1531_v39, %v394_v43 }
 0x77b   :  { %v403_v49 = vsel %vm400_vm2, %v402_v47, %v398_v46 }
 0x77c   :  { %v406_v51 = vmul.f32 %v403_v49, %v348_v25  ;;  %v70_v25 = vld [vmem:[%s2117_s0 + $0x28] sm:$0xff] }
 0x77d   :  { %1434 = vmatmul.msk.f32.gmra.mxu0 %vm79_vm0, %v70_v25 }
 0x7d9   :  { %v409_v48 = vpop.permute.xlu0 %408 }
 0x7da   :  { %v411_v50 = vmul.f32 %v409_v48, %v403_v49 }
 0x7dc   :  { %413 = vrot.lane.b32.xlu1 %v411_v50, %s1714_s3 }
 0x7fa   :  { %v136_v34 = vpop.f32.mrf.mxu0 }
 0x7fb   :  { %v137_v35 = vadd.f32 %v1840_v8, %v136_v34 }
 0x84e   :  { %v414_v52 = vpop.permute.xlu1 %413 }
 0x84f   :  { %v416_v53 = vadd.f32 %v414_v52, %v406_v51 }
 0x851   :  { %1532 = vtanh.f32 %v416_v53 }
 0x857   :  { %v1533_v54 = vpop.eup %1532 }
 0x858   :  { %419 = vrot.lane.b32.xlu2 %v1533_v54, %s1713_s12 }
 0x8b2   :  { %v420_v55 = vpop.permute.xlu2 %419 }
 0x8b3   :  { %v422_v56 = vmul.f32 %v420_v55, %v403_v49 }
 0x8b5   :  { %424 = vrot.lane.b32.xlu0 %v422_v56, %s1714_s3 }
 0x927   :  { %v425_v58 = vpop.permute.xlu0 %424 }
 0x928   :  { %428 = vst.msk [vmem:[#allocation2 + $0x18] sm:$0xff] %vm158_vm5, %v425_v58  ;;  %1444 = vmatmul.msk.f32.vlgmr.msrb.gmra.mxu2 %vm158_vm5, %v425_v58  ;;  %v71_v58 = vld [vmem:[%s2117_s0 + $0x30] sm:$0xff] }
 0x929   :  { %1435 = vmatmul.msk.f32.gmra.mxu0 %vm79_vm0, %v71_v58  ;;  %v1984_v58 = vld [vmem:[#allocation7 + $0x18] sm:$0xff] }
 0x92a   :  { %1372 = vmatpush.msrb.mxu0 %v1984_v58 }
 0x92f   :  { %v704_v32 = vld [vmem:[#allocation2 + $0x18] sm:$0xff] }
 0x9ab   :  { %v450_v61 = vpop.f32.mrf.mxu2 }
 0x9ac   :  { %v453_v62 = vadd.f32 %v450_v61, %v134_v60  ;;  %v1930_v61 = vld [vmem:[#allocation4 + $0x18] sm:$0xff] }
 0x9ad   :  { %807 = vmatpush.msrb.mxu1 %v1930_v61  ;;  %873 = vmatpush.msrb.mxu2 %v1930_v61 }
 0x9ae   :  { %1534 = vtanh.f32 %v453_v62  ;;  %v1445_v0 = vmul.f32 -1.442695, %v453_v62  ;;  %v1932_v62 = vld [vmem:[#allocation4 + $0x10] sm:$0xff] }
 0x9af   :  { %808 = vmatpush.msrb.mxu1 %v1932_v62  ;;  %874 = vmatpush.msrb.mxu2 %v1932_v62 }
 0x9b0   :  { %1536 = vpow2.f32 %v1445_v0  ;;  %v1940_v0 = vld [vmem:[#allocation4] sm:$0xff] }
 0x9b4   :  { %v1535_v63 = vpop.eup %1534 }
 0x9b5   :  { %476 = vrot.lane.b32.xlu1 %v1535_v63, %s1713_s12  ;;  %v1936_v63 = vld [vmem:[#allocation4 + $0x8] sm:$0xff] }
 0x9b6   :  { %v1537_v1 = vpop.eup %1536  ;;  %809 = vmatpush.msrb.mxu1 %v1936_v63  ;;  %875 = vmatpush.msrb.mxu2 %v1936_v63 }
 0x9b7   :  { %v457_v2 = vadd.f32 1.0, %v1537_v1 }
 0x9b8   :  { %810 = vmatpush.msrb.mxu1 %v1940_v0  ;;  %876 = vmatpush.msrb.mxu2 %v1940_v0 }
 0x9b9   :  { %1538 = vrcp.f32 %v457_v2  ;;  %v469_v10 = vand.u32 2147483648, %v457_v2  ;;  %vm463_vm4 = vweird.f32 %v457_v2  ;;  %v467_v11 = vand.u32 2147483647, %v457_v2 }
 0x9bb   :  { %v470_v13 = vor.u32 1.1754944e-38, %v469_v10  ;;  %vm468_vm7 = vcmp.eq.f32.partialorder %v467_v11, 8.507059e+37 }
 0x9bf   :  { %v1539_v3 = vpop.eup %1538 }
 0x9c0   :  { %v459_v4 = vmul.f32 %v1539_v3, %v457_v2  ;;  %vm464_vm3 = vweird.f32 %v1539_v3 }
 0x9c1   :  { %vm465_vm6 = vmor %vm463_vm4, %vm464_vm3 }
 0x9c2   :  { %v460_v5 = vsub.f32 1.0, %v459_v4 }
 0x9c4   :  { %v461_v6 = vmul.f32 %v1539_v3, %v460_v5 }
 0x9c6   :  { %v462_v9 = vadd.f32 %v1539_v3, %v461_v6 }
 0x9c8   :  { %v466_v12 = vsel %vm465_vm6, %v1539_v3, %v462_v9  ;;  %v139_v3 = vpop.f32.mrf.mxu0  ;;  %v1962_v9 = vld [vmem:[%s2123_s6] ss:$0 sm:$0xff] }
 0x9c9   :  { %v471_v15 = vsel %vm468_vm7, %v470_v13, %v466_v12  ;;  %v140_v4 = vadd.f32 %v1840_v8, %v139_v3 }
 0x9ca   :  { %v474_v17 = vmul.f32 %v471_v15, %v416_v53 }
 0xa27   :  { %v477_v14 = vpop.permute.xlu1 %476 }
 0xa28   :  { %v479_v16 = vmul.f32 %v477_v14, %v471_v15 }
 0xa2a   :  { %481 = vrot.lane.b32.xlu2 %v479_v16, %s1714_s3 }
 0xa84   :  { %v482_v18 = vpop.permute.xlu2 %481 }
 0xa85   :  { %v484_v19 = vadd.f32 %v482_v18, %v474_v17 }
 0xa87   :  { %1540 = vtanh.f32 %v484_v19 }
 0xa8d   :  { %v1541_v20 = vpop.eup %1540 }
 0xa8e   :  { %487 = vrot.lane.b32.xlu0 %v1541_v20, %s1713_s12 }
 0xb00   :  { %v488_v21 = vpop.permute.xlu0 %487 }
 0xb01   :  { %v490_v22 = vmul.f32 %v488_v21, %v471_v15 }
 0xb03   :  { %492 = vrot.lane.b32.xlu1 %v490_v22, %s1714_s3 }
 0xb75   :  { %v493_v28 = vpop.permute.xlu1 %492 }
 0xb76   :  { %496 = vst.msk [vmem:[#allocation2 + $0x20] sm:$0xff] %vm158_vm5, %v493_v28  ;;  %1446 = vmatmul.msk.f32.vlgmr.msrb.gmra.mxu3 %vm158_vm5, %v493_v28 }
 0xb7d   :  { %v705_v33 = vld [vmem:[#allocation2 + $0x20] sm:$0xff] }
 0xb7e   :  { %1452 = vmatmul.msk.f32.vlgmr.msra.gmra.mxu3 %vm158_vm5, %v701_v29 }
 0xb86   :  { %1453 = vmatmul.msk.f32.gmra.mxu3 %vm158_vm5, %v702_v30 }
 0xb8e   :  { %1454 = vmatmul.msk.f32.gmra.mxu3 %vm158_vm5, %v703_v31 }
 0xb96   :  { %1455 = vmatmul.msk.f32.gmra.mxu3 %vm158_vm5, %v704_v32 }
 0xb9e   :  { %1456 = vmatmul.msk.f32.gmra.mxu3 %vm158_vm5, %v705_v33 }
 0xbf9   :  { %v518_v36 = vpop.f32.mrf.mxu3 }
 0xbfa   :  { %v521_v37 = vadd.f32 %v518_v36, %v137_v35 }
 0xbfc   :  { %1542 = vtanh.f32 %v521_v37  ;;  %v1447_v39 = vmul.f32 -1.442695, %v521_v37 }
 0xbfe   :  { %1544 = vpow2.f32 %v1447_v39 }
 0xc02   :  { %v1543_v38 = vpop.eup %1542 }
 0xc03   :  { %544 = vrot.lane.b32.xlu2 %v1543_v38, %s1713_s12 }
 0xc04   :  { %v1545_v40 = vpop.eup %1544 }
 0xc05   :  { %v525_v41 = vadd.f32 1.0, %v1545_v40 }
 0xc07   :  { %1546 = vrcp.f32 %v525_v41  ;;  %v537_v47 = vand.u32 2147483648, %v525_v41  ;;  %vm531_vm9 = vweird.f32 %v525_v41  ;;  %v535_v48 = vand.u32 2147483647, %v525_v41 }
 0xc09   :  { %v538_v50 = vor.u32 1.1754944e-38, %v537_v47  ;;  %vm536_vm11 = vcmp.eq.f32.partialorder %v535_v48, 8.507059e+37 }
 0xc0d   :  { %v1547_v42 = vpop.eup %1546 }
 0xc0e   :  { %v527_v43 = vmul.f32 %v1547_v42, %v525_v41  ;;  %vm532_vm8 = vweird.f32 %v1547_v42 }
 0xc0f   :  { %vm533_vm10 = vmor %vm531_vm9, %vm532_vm8 }
 0xc10   :  { %v528_v44 = vsub.f32 1.0, %v527_v43 }
 0xc12   :  { %v529_v45 = vmul.f32 %v1547_v42, %v528_v44 }
 0xc14   :  { %v530_v46 = vadd.f32 %v1547_v42, %v529_v45 }
 0xc16   :  { %v534_v49 = vsel %vm533_vm10, %v1547_v42, %v530_v46 }
 0xc17   :  { %v539_v52 = vsel %vm536_vm11, %v538_v50, %v534_v49 }
 0xc18   :  { %v542_v54 = vmul.f32 %v539_v52, %v484_v19 }
 0xc5d   :  { %v545_v51 = vpop.permute.xlu2 %544 }
 0xc5e   :  { %v547_v53 = vmul.f32 %v545_v51, %v539_v52 }
 0xc60   :  { %549 = vrot.lane.b32.xlu0 %v547_v53, %s1714_s3 }
 0xcd2   :  { %v550_v55 = vpop.permute.xlu0 %549 }
 0xcd3   :  { %v1921_v56 = vadd.f32 %v550_v55, %v542_v54 }
 0xcd5   :  { %1548 = vtanh.f32 %v1921_v56 }
 0xcdb   :  { %v1549_v57 = vpop.eup %1548 }
 0xcdc   :  { %555 = vrot.lane.b32.xlu1 %v1549_v57, %s1713_s12  ;;  %v72_v57 = vld [vmem:[%s2117_s0 + $0x38] sm:$0xff] }
 0xcdd   :  { %1436 = vmatmul.msk.f32.gmra.mxu0 %vm79_vm0, %v72_v57 }
 0xd4e   :  { %v556_v59 = vpop.permute.xlu1 %555 }
 0xd4f   :  { %v558_v60 = vmul.f32 %v556_v59, %v539_v52  ;;  %v1986_v59 = vld [vmem:[#allocation7 + $0x10] sm:$0xff] }
 0xd50   :  { %1373 = vmatpush.msrb.mxu0 %v1986_v59 }
 0xd51   :  { %560 = vrot.lane.b32.xlu2 %v558_v60, %s1714_s3  ;;  %v1989_v60 = vld [vmem:[#allocation7 + $0x8] sm:$0xff] }
 0xd52   :  { %1374 = vmatpush.msrb.mxu0 %v1989_v60 }
 0xdab   :  { %v561_v1 = vpop.permute.xlu2 %560 }
 0xdac   :  { %564 = vst.msk [vmem:[#allocation2 + $0x28] sm:$0xff] %vm158_vm5, %v561_v1  ;;  %1448 = vmatmul.msk.f32.vlgmr.msra.gmra.mxu1 %vm158_vm5, %v561_v1  ;;  %v1992_v1 = vld [vmem:[#allocation7] sm:$0xff] }
 0xdad   :  { %939 = vmatpush.msra.mxu1 %v1930_v61  ;;  %1375 = vmatpush.msrb.mxu0 %v1992_v1 }
 0xdaf   :  { %940 = vmatpush.msra.mxu1 %v1932_v62 }
 0xdb1   :  { %941 = vmatpush.msra.mxu1 %v1936_v63 }
 0xdb3   :  { %v706_v2 = vld [vmem:[#allocation2 + $0x28] sm:$0xff]  ;;  %942 = vmatpush.msra.mxu1 %v1940_v0 }
 0xdb4   :  { %1457 = vmatmul.msk.f32.gmra.mxu3 %vm158_vm5, %v706_v2  ;;  %811 = vmatmul.f32.vlgmr.msrb.gmra.mxu1 %v1712_v7  ;;  %v758_v7 = vpop.f32.mrf.mxu3 }
 0xdb5   :  { %1071 = vmatpush.msrb.mxu1 %v1930_v61  ;;  %v759_v10 = vadd.f32 %v1962_v9, %v758_v7 }
 0xdb7   :  { %1072 = vmatpush.msrb.mxu1 %v1932_v62 }
 0xdb9   :  { %1073 = vmatpush.msrb.mxu1 %v1936_v63 }
 0xdbb   :  { %1074 = vmatpush.msrb.mxu1 %v1940_v0 }
 0xe29   :  { %v586_v5 = vpop.f32.mrf.mxu1 }
 0xe2a   :  { %v589_v6 = vadd.f32 %v586_v5, %v140_v4 }
 0xe2c   :  { %1550 = vtanh.f32 %v589_v6  ;;  %v1449_v15 = vmul.f32 -1.442695, %v589_v6  ;;  %v142_v6 = vpop.f32.mrf.mxu0 }
 0xe2d   :  { %v143_v7 = vadd.f32 %v1840_v8, %v142_v6 }
 0xe31   :  { %v812_v11 = vpop.f32.mrf.mxu1 }
 0xe32   :  { %v1551_v12 = vpop.eup %1550  ;;  %v815_v13 = vadd.f32 %v812_v11, %v759_v10 }
 0xe33   :  { %612 = vrot.lane.b32.xlu0 %v1551_v12, %s1713_s12  ;;  %v761_v12 = vpop.f32.mrf.mxu3 }
 0xe34   :  { %1552 = vtanh.f32 %v815_v13  ;;  %v1460_v16 = vmul.f32 -1.442695, %v815_v13  ;;  %v762_v13 = vadd.f32 %v1962_v9, %v761_v12 }
 0xe35   :  { %1554 = vpow2.f32 %v1449_v15 }
 0xe36   :  { %1556 = vpow2.f32 %v1460_v16 }
 0xe3a   :  { %v1553_v14 = vpop.eup %1552 }
 0xe3b   :  { %838 = vrot.lane.b32.xlu1 %v1553_v14, %s1713_s12  ;;  %v1555_v17 = vpop.eup %1554  ;;  %v2017_v14 = vld [vmem:[%s2125_s8] ss:$0 sm:$0xff]  ;;  %s1715_s8 = smov [#allocation9]  }
 0xe3c   :  { %v593_v18 = vadd.f32 1.0, %v1555_v17  ;;  %v1557_v19 = vpop.eup %1556  ;;  %s1413_s14 = sshll.u32 %s1715_s8, 4  ;;  %s1414_s14 = int_to_ptr.vmem [resolvable:$true] %s1413_s14 }
 0xe3d   :  { %v819_v20 = vadd.f32 1.0, %v1557_v19 }
 0xe3e   :  { %1558 = vrcp.f32 %v593_v18  ;;  %v605_v29 = vand.u32 2147483648, %v593_v18  ;;  %vm599_vm13 = vweird.f32 %v593_v18  ;;  %v603_v30 = vand.u32 2147483647, %v593_v18 }
 0xe3f   :  { %1560 = vrcp.f32 %v819_v20  ;;  %v831_v38 = vand.u32 2147483648, %v819_v20  ;;  %vm825_vm2 = vweird.f32 %v819_v20  ;;  %v829_v39 = vand.u32 2147483647, %v819_v20 }
 0xe40   :  { %v606_v33 = vor.u32 1.1754944e-38, %v605_v29  ;;  %vm604_vm15 = vcmp.eq.f32.partialorder %v603_v30, 8.507059e+37 }
 0xe41   :  { %v832_v41 = vor.u32 1.1754944e-38, %v831_v38  ;;  %vm830_vm4 = vcmp.eq.f32.partialorder %v829_v39, 8.507059e+37 }
 0xe44   :  { %v1559_v21 = vpop.eup %1558 }
 0xe45   :  { %v595_v22 = vmul.f32 %v1559_v21, %v593_v18  ;;  %v1561_v24 = vpop.eup %1560  ;;  %vm600_vm12 = vweird.f32 %v1559_v21 }
 0xe46   :  { %v821_v26 = vmul.f32 %v1561_v24, %v819_v20  ;;  %vm601_vm14 = vmor %vm599_vm13, %vm600_vm12  ;;  %vm826_vm1 = vweird.f32 %v1561_v24 }
 0xe47   :  { %v596_v23 = vsub.f32 1.0, %v595_v22  ;;  %vm827_vm3 = vmor %vm825_vm2, %vm826_vm1 }
 0xe48   :  { %v822_v28 = vsub.f32 1.0, %v821_v26 }
 0xe49   :  { %v597_v25 = vmul.f32 %v1559_v21, %v596_v23 }
 0xe4a   :  { %v823_v32 = vmul.f32 %v1561_v24, %v822_v28 }
 0xe4b   :  { %v598_v27 = vadd.f32 %v1559_v21, %v597_v25 }
 0xe4c   :  { %v824_v37 = vadd.f32 %v1561_v24, %v823_v32 }
 0xe4d   :  { %v602_v31 = vsel %vm601_vm14, %v1559_v21, %v598_v27 }
 0xe4e   :  { %v607_v35 = vsel %vm604_vm15, %v606_v33, %v602_v31  ;;  %v828_v40 = vsel %vm827_vm3, %v1561_v24, %v824_v37 }
 0xe4f   :  { %v833_v43 = vsel %vm830_vm4, %v832_v41, %v828_v40  ;;  %v610_v45 = vmul.f32 %v607_v35, %v1921_v56 }
 0xe50   :  { %v836_v49 = vmul.f32 0.0, %v833_v43 }
 0xea5   :  { %v613_v34 = vpop.permute.xlu0 %612 }
 0xea6   :  { %v615_v36 = vmul.f32 %v613_v34, %v607_v35 }
 0xea8   :  { %617 = vrot.lane.b32.xlu2 %v615_v36, %s1714_s3 }
 0xead   :  { %v839_v42 = vpop.permute.xlu1 %838 }
 0xeae   :  { %v841_v44 = vmul.f32 %v839_v42, %v833_v43  ;;  %v764_v42 = vpop.f32.mrf.mxu3 }
 0xeb0   :  { %843 = vrot.lane.b32.xlu0 %v841_v44, %s1714_s3 }
 0xf02   :  { %v618_v46 = vpop.permute.xlu2 %617 }
 0xf03   :  { %v1970_v47 = vadd.f32 %v618_v46, %v610_v45 }
 0xf05   :  { %1562 = vtanh.f32 %v1970_v47 }
 0xf0b   :  { %v1563_v48 = vpop.eup %1562 }
 0xf0c   :  { %623 = vrot.lane.b32.xlu1 %v1563_v48, %s1713_s12 }
 0xf22   :  { %v844_v50 = vpop.permute.xlu0 %843 }
 0xf23   :  { %v1974_v51 = vadd.f32 %v844_v50, %v836_v49 }
 0xf25   :  { %1564 = vtanh.f32 %v1974_v51 }
 0xf2b   :  { %v1565_v52 = vpop.eup %1564 }
 0xf2c   :  { %849 = vrot.lane.b32.xlu2 %v1565_v52, %s1713_s12 }
 0xf7e   :  { %v624_v53 = vpop.permute.xlu1 %623 }
 0xf7f   :  { %v626_v54 = vmul.f32 %v624_v53, %v607_v35 }
 0xf81   :  { %628 = vrot.lane.b32.xlu0 %v626_v54, %s1714_s3 }
 0xf86   :  { %v850_v55 = vpop.permute.xlu2 %849 }
 0xf87   :  { %v852_v56 = vmul.f32 %v850_v55, %v833_v43  ;;  %v765_v43 = vadd.f32 %v1962_v9, %v764_v42 }
 0xf89   :  { %854 = vrot.lane.b32.xlu1 %v852_v56, %s1714_s3 }
 0xff3   :  { %v629_v2 = vpop.permute.xlu0 %628 }
 0xff4   :  { %632 = vst.msk [vmem:[#allocation2 + $0x30] sm:$0xff] %vm158_vm5, %v629_v2  ;;  %1450 = vmatmul.msk.f32.vlgmr.msra.gmra.mxu2 %vm158_vm5, %v629_v2 }
 0xff5   :  { %1005 = vmatpush.msra.mxu2 %v1930_v61 }
 0xff7   :  { %1006 = vmatpush.msra.mxu2 %v1932_v62 }
 0xff9   :  { %1007 = vmatpush.msra.mxu2 %v1936_v63 }
 0xffb   :  { %v855_v3 = vpop.permute.xlu1 %854  ;;  %v707_v4 = vld [vmem:[#allocation2 + $0x30] sm:$0xff]  ;;  %1008 = vmatpush.msra.mxu2 %v1940_v0 }
 0xffc   :  { %857 = vst.msk [vmem:[#allocation2] sm:$0xff] %vm158_vm5, %v855_v3  ;;  %1458 = vmatmul.msk.f32.gmra.mxu3 %vm158_vm5, %v707_v4  ;;  %1461 = vmatmul.msk.f32.vlgmr.msrb.gmra.mxu2 %vm158_vm5, %v855_v3 }
 0xffd   :  { %1137 = vmatpush.msrb.mxu2 %v1930_v61 }
 0xfff   :  { %1138 = vmatpush.msrb.mxu2 %v1932_v62 }
0x1001   :  { %1139 = vmatpush.msrb.mxu2 %v1936_v63 }
0x1003   :  { %v1320_v5 = vld [vmem:[#allocation2] sm:$0xff]  ;;  %1140 = vmatpush.msrb.mxu2 %v1940_v0 }
0x1004   :  { %1475 = vmatmul.msk.f32.vlgmr.msrb.gmra.mxu0 %vm158_vm5, %v1320_v5 }
0x1077   :  { %v654_v10 = vpop.f32.mrf.mxu2 }
0x1078   :  { %v2011_v11 = vadd.f32 %v654_v10, %v143_v7 }
0x107f   :  { %v878_v15 = vpop.f32.mrf.mxu2 }
0x1080   :  { %v881_v16 = vadd.f32 %v878_v15, %v762_v13 }
0x1081   :  { %v1377_v17 = vpop.f32.mrf.mxu0 }
0x1082   :  { %1566 = vtanh.f32 %v881_v16  ;;  %v1378_v18 = vadd.f32 %v2017_v14, %v1377_v17  ;;  %v1462_v8 = vmul.f32 -1.442695, %v881_v16 }
0x1084   :  { %1401 = vst [vmem:[#allocation9] sm:$0xff] %v1378_v18  ;;  %1568 = vpow2.f32 %v1462_v8  ;;  %v767_v8 = vpop.f32.mrf.mxu3 }
0x1088   :  { %v1567_v19 = vpop.eup %1566 }
0x1089   :  { %904 = vrot.lane.b32.xlu2 %v1567_v19, %s1713_s12 }
0x108a   :  { %v1569_v20 = vpop.eup %1568 }
0x108b   :  { %v885_v21 = vadd.f32 1.0, %v1569_v20  ;;  %v768_v20 = vadd.f32 %v1962_v9, %v767_v8 }
0x108c   :  { %v770_v42 = vpop.f32.mrf.mxu3 }
0x108d   :  { %1570 = vrcp.f32 %v885_v21  ;;  %v897_v27 = vand.u32 2147483648, %v885_v21  ;;  %vm891_vm6 = vweird.f32 %v885_v21  ;;  %v895_v28 = vand.u32 2147483647, %v885_v21 }
0x108f   :  { %v898_v30 = vor.u32 1.1754944e-38, %v897_v27  ;;  %vm896_vm8 = vcmp.eq.f32.partialorder %v895_v28, 8.507059e+37 }
0x1093   :  { %v1571_v22 = vpop.eup %1570 }
0x1094   :  { %v887_v23 = vmul.f32 %v1571_v22, %v885_v21  ;;  %vm892_vm0 = vweird.f32 %v1571_v22 }
0x1095   :  { %vm893_vm7 = vmor %vm891_vm6, %vm892_vm0 }
0x1096   :  { %v888_v24 = vsub.f32 1.0, %v887_v23 }
0x1098   :  { %v889_v25 = vmul.f32 %v1571_v22, %v888_v24 }
0x109a   :  { %v890_v26 = vadd.f32 %v1571_v22, %v889_v25 }
0x109c   :  { %v894_v29 = vsel %vm893_vm7, %v1571_v22, %v890_v26 }
0x109d   :  { %v899_v32 = vsel %vm896_vm8, %v898_v30, %v894_v29 }
0x109e   :  { %v902_v34 = vmul.f32 %v899_v32, %v1974_v51 }
0x10e3   :  { %v905_v31 = vpop.permute.xlu2 %904 }
0x10e4   :  { %v907_v33 = vmul.f32 %v905_v31, %v899_v32 }
0x10e6   :  { %909 = vrot.lane.b32.xlu0 %v907_v33, %s1714_s3 }
0x1158   :  { %v910_v35 = vpop.permute.xlu0 %909 }
0x1159   :  { %v912_v36 = vadd.f32 %v910_v35, %v902_v34 }
0x115b   :  { %1572 = vtanh.f32 %v912_v36 }
0x1161   :  { %v1573_v37 = vpop.eup %1572 }
0x1162   :  { %915 = vrot.lane.b32.xlu1 %v1573_v37, %s1713_s12 }
0x11d4   :  { %v916_v38 = vpop.permute.xlu1 %915 }
0x11d5   :  { %v918_v39 = vmul.f32 %v916_v38, %v899_v32 }
0x11d7   :  { %920 = vrot.lane.b32.xlu2 %v918_v39, %s1714_s3 }
0x1231   :  { %v921_v40 = vpop.permute.xlu2 %920 }
0x1232   :  { %923 = vst.msk [vmem:[#allocation2 + $0x8] sm:$0xff] %vm158_vm5, %v921_v40  ;;  %1463 = vmatmul.msk.f32.vlgmr.msra.gmra.mxu1 %vm158_vm5, %v921_v40 }
0x1233   :  { %1203 = vmatpush.msra.mxu1 %v1930_v61 }
0x1235   :  { %1204 = vmatpush.msra.mxu1 %v1932_v62 }
0x1237   :  { %1205 = vmatpush.msra.mxu1 %v1936_v63 }
0x1239   :  { %v1321_v41 = vld [vmem:[#allocation2 + $0x8] sm:$0xff]  ;;  %1206 = vmatpush.msra.mxu1 %v1940_v0 }
0x123a   :  { %1476 = vmatmul.msk.f32.gmra.mxu0 %vm158_vm5, %v1321_v41 }
0x12af   :  { %v944_v44 = vpop.f32.mrf.mxu1 }
0x12b0   :  { %v947_v45 = vadd.f32 %v944_v44, %v765_v43  ;;  %v771_v43 = vadd.f32 %v1962_v9, %v770_v42 }
0x12b2   :  { %1574 = vtanh.f32 %v947_v45  ;;  %v1464_v50 = vmul.f32 -1.442695, %v947_v45 }
0x12b4   :  { %1576 = vpow2.f32 %v1464_v50 }
0x12b7   :  { %v1380_v46 = vpop.f32.mrf.mxu0 }
0x12b8   :  { %v1575_v48 = vpop.eup %1574  ;;  %v1381_v49 = vadd.f32 %v2017_v14, %v1380_v46 }
0x12b9   :  { %970 = vrot.lane.b32.xlu0 %v1575_v48, %s1713_s12 }
0x12ba   :  { %1402 = vst [vmem:[#allocation9 + $0x8] sm:$0xff] %v1381_v49  ;;  %v1577_v51 = vpop.eup %1576 }
0x12bb   :  { %v951_v52 = vadd.f32 1.0, %v1577_v51 }
0x12bd   :  { %1578 = vrcp.f32 %v951_v52  ;;  %v963_v2 = vand.u32 2147483648, %v951_v52  ;;  %vm957_vm10 = vweird.f32 %v951_v52  ;;  %v961_v3 = vand.u32 2147483647, %v951_v52 }
0x12bf   :  { %v964_v5 = vor.u32 1.1754944e-38, %v963_v2  ;;  %vm962_vm12 = vcmp.eq.f32.partialorder %v961_v3, 8.507059e+37 }
0x12c3   :  { %v1579_v53 = vpop.eup %1578 }
0x12c4   :  { %v953_v54 = vmul.f32 %v1579_v53, %v951_v52  ;;  %vm958_vm9 = vweird.f32 %v1579_v53 }
0x12c5   :  { %vm959_vm11 = vmor %vm957_vm10, %vm958_vm9 }
0x12c6   :  { %v954_v55 = vsub.f32 1.0, %v953_v54 }
0x12c8   :  { %v955_v56 = vmul.f32 %v1579_v53, %v954_v55 }
0x12ca   :  { %v956_v57 = vadd.f32 %v1579_v53, %v955_v56 }
0x12cc   :  { %v960_v4 = vsel %vm959_vm11, %v1579_v53, %v956_v57 }
0x12cd   :  { %v965_v7 = vsel %vm962_vm12, %v964_v5, %v960_v4 }
0x12ce   :  { %v968_v12 = vmul.f32 %v965_v7, %v912_v36 }
0x132b   :  { %v971_v6 = vpop.permute.xlu0 %970 }
0x132c   :  { %v973_v10 = vmul.f32 %v971_v6, %v965_v7 }
0x132e   :  { %975 = vrot.lane.b32.xlu1 %v973_v10, %s1714_s3 }
0x13a0   :  { %v976_v13 = vpop.permute.xlu1 %975 }
0x13a1   :  { %v978_v15 = vadd.f32 %v976_v13, %v968_v12 }
0x13a3   :  { %1580 = vtanh.f32 %v978_v15 }
0x13a9   :  { %v1581_v16 = vpop.eup %1580 }
0x13aa   :  { %981 = vrot.lane.b32.xlu2 %v1581_v16, %s1713_s12 }
0x1404   :  { %v982_v17 = vpop.permute.xlu2 %981 }
0x1405   :  { %v984_v18 = vmul.f32 %v982_v17, %v965_v7 }
0x1407   :  { %986 = vrot.lane.b32.xlu0 %v984_v18, %s1714_s3  ;;  %v773_v18 = vpop.f32.mrf.mxu3 }
0x1479   :  { %v987_v19 = vpop.permute.xlu0 %986 }
0x147a   :  { %989 = vst.msk [vmem:[#allocation2 + $0x10] sm:$0xff] %vm158_vm5, %v987_v19  ;;  %1465 = vmatmul.msk.f32.vlgmr.msra.gmra.mxu2 %vm158_vm5, %v987_v19  ;;  %v774_v19 = vadd.f32 %v1962_v9, %v773_v18 }
0x147b   :  { %1269 = vmatpush.msra.mxu2 %v1930_v61 }
0x147d   :  { %1270 = vmatpush.msra.mxu2 %v1932_v62 }
0x147f   :  { %1271 = vmatpush.msra.mxu2 %v1936_v63 }
0x1481   :  { %1272 = vmatpush.msra.mxu2 %v1940_v0 }
0x14fd   :  { %v1010_v21 = vpop.f32.mrf.mxu2 }
0x14fe   :  { %v1013_v22 = vadd.f32 %v1010_v21, %v768_v20 }
0x1500   :  { %1582 = vtanh.f32 %v1013_v22  ;;  %v1466_v24 = vmul.f32 -1.442695, %v1013_v22 }
0x1502   :  { %1584 = vpow2.f32 %v1466_v24 }
0x1506   :  { %v1583_v23 = vpop.eup %1582 }
0x1507   :  { %1036 = vrot.lane.b32.xlu1 %v1583_v23, %s1713_s12 }
0x1508   :  { %v1585_v25 = vpop.eup %1584 }
0x1509   :  { %v1017_v26 = vadd.f32 1.0, %v1585_v25 }
0x150b   :  { %1586 = vrcp.f32 %v1017_v26  ;;  %v1029_v0 = vand.u32 2147483648, %v1017_v26  ;;  %vm1023_vm14 = vweird.f32 %v1017_v26  ;;  %v1027_v29 = vand.u32 2147483647, %v1017_v26 }
0x150d   :  { %v1030_v31 = vor.u32 1.1754944e-38, %v1029_v0  ;;  %vm1028_vm1 = vcmp.eq.f32.partialorder %v1027_v29, 8.507059e+37 }
0x1511   :  { %v1587_v61 = vpop.eup %1586 }
0x1512   :  { %v1019_v62 = vmul.f32 %v1587_v61, %v1017_v26  ;;  %vm1024_vm13 = vweird.f32 %v1587_v61 }
0x1513   :  { %vm1025_vm15 = vmor %vm1023_vm14, %vm1024_vm13 }
0x1514   :  { %v1020_v27 = vsub.f32 1.0, %v1019_v62 }
0x1516   :  { %v1021_v63 = vmul.f32 %v1587_v61, %v1020_v27 }
0x1518   :  { %v1022_v28 = vadd.f32 %v1587_v61, %v1021_v63 }
0x151a   :  { %v1026_v30 = vsel %vm1025_vm15, %v1587_v61, %v1022_v28 }
0x151b   :  { %v1031_v33 = vsel %vm1028_vm1, %v1030_v31, %v1026_v30 }
0x151c   :  { %v1034_v35 = vmul.f32 %v1031_v33, %v978_v15 }
0x1579   :  { %v1037_v32 = vpop.permute.xlu1 %1036 }
0x157a   :  { %v1039_v34 = vmul.f32 %v1037_v32, %v1031_v33 }
0x157c   :  { %1041 = vrot.lane.b32.xlu2 %v1039_v34, %s1714_s3  ;;  %v1451_v34 = vmul.f32 -1.442695, %v2011_v11 }
0x15d6   :  { %v1042_v36 = vpop.permute.xlu2 %1041 }
0x15d7   :  { %v1044_v37 = vadd.f32 %v1042_v36, %v1034_v35 }
0x15d9   :  { %1588 = vtanh.f32 %v1044_v37 }
0x15df   :  { %v1589_v38 = vpop.eup %1588 }
0x15e0   :  { %1047 = vrot.lane.b32.xlu0 %v1589_v38, %s1713_s12 }
0x1652   :  { %v1048_v39 = vpop.permute.xlu0 %1047 }
0x1653   :  { %v1050_v40 = vmul.f32 %v1048_v39, %v1031_v33 }
0x1655   :  { %1052 = vrot.lane.b32.xlu1 %v1050_v40, %s1714_s3 }
0x16c7   :  { %v1053_v41 = vpop.permute.xlu1 %1052 }
0x16c8   :  { %1055 = vst.msk [vmem:[#allocation2 + $0x18] sm:$0xff] %vm158_vm5, %v1053_v41  ;;  %1467 = vmatmul.msk.f32.vlgmr.msrb.gmra.mxu1 %vm158_vm5, %v1053_v41 }
0x16c9   :  { %1483 = vmatpush.msrb.mxu1 %v1984_v58 }
0x16cb   :  { %1485 = vmatpush.msrb.mxu1 %v1986_v59 }
0x16cd   :  { %1487 = vmatpush.msrb.mxu1 %v1989_v60 }
0x16cf   :  { %1489 = vmatpush.msrb.mxu1 %v1992_v1 }
0x1745   :  { %v1076_v44 = vpop.f32.mrf.mxu1 }
0x1746   :  { %v1079_v45 = vadd.f32 %v1076_v44, %v771_v43 }
0x1748   :  { %1590 = vtanh.f32 %v1079_v45  ;;  %v1468_v48 = vmul.f32 -1.442695, %v1079_v45 }
0x174a   :  { %1592 = vpow2.f32 %v1468_v48 }
0x174e   :  { %v1591_v46 = vpop.eup %1590 }
0x174f   :  { %1102 = vrot.lane.b32.xlu2 %v1591_v46, %s1713_s12 }
0x1750   :  { %v1593_v49 = vpop.eup %1592 }
0x1751   :  { %v1083_v50 = vadd.f32 1.0, %v1593_v49 }
0x1753   :  { %1594 = vrcp.f32 %v1083_v50  ;;  %v1095_v56 = vand.u32 2147483648, %v1083_v50  ;;  %vm1089_vm3 = vweird.f32 %v1083_v50  ;;  %v1093_v57 = vand.u32 2147483647, %v1083_v50 }
0x1755   :  { %v1096_v3 = vor.u32 1.1754944e-38, %v1095_v56  ;;  %vm1094_vm0 = vcmp.eq.f32.partialorder %v1093_v57, 8.507059e+37 }
0x1759   :  { %v1595_v51 = vpop.eup %1594 }
0x175a   :  { %v1085_v52 = vmul.f32 %v1595_v51, %v1083_v50  ;;  %vm1090_vm2 = vweird.f32 %v1595_v51 }
0x175b   :  { %vm1091_vm4 = vmor %vm1089_vm3, %vm1090_vm2 }
0x175c   :  { %v1086_v53 = vsub.f32 1.0, %v1085_v52  ;;  %v1322_v52 = vld [vmem:[#allocation2 + $0x10] sm:$0xff] }
0x175e   :  { %v1087_v54 = vmul.f32 %v1595_v51, %v1086_v53  ;;  %v1323_v53 = vld [vmem:[#allocation2 + $0x18] sm:$0xff] }
0x1760   :  { %v1088_v55 = vadd.f32 %v1595_v51, %v1087_v54 }
0x1762   :  { %v1092_v2 = vsel %vm1091_vm4, %v1595_v51, %v1088_v55  ;;  %v776_v55 = vpop.f32.mrf.mxu3 }
0x1763   :  { %v1097_v5 = vsel %vm1094_vm0, %v1096_v3, %v1092_v2  ;;  %v777_v56 = vadd.f32 %v1962_v9, %v776_v55 }
0x1764   :  { %v1100_v7 = vmul.f32 %v1097_v5, %v1044_v37 }
0x17a9   :  { %v1103_v4 = vpop.permute.xlu2 %1102 }
0x17aa   :  { %v1105_v6 = vmul.f32 %v1103_v4, %v1097_v5 }
0x17ac   :  { %1107 = vrot.lane.b32.xlu0 %v1105_v6, %s1714_s3 }
0x181e   :  { %v1108_v10 = vpop.permute.xlu0 %1107 }
0x181f   :  { %v1110_v12 = vadd.f32 %v1108_v10, %v1100_v7 }
0x1821   :  { %1596 = vtanh.f32 %v1110_v12 }
0x1827   :  { %v1597_v13 = vpop.eup %1596 }
0x1828   :  { %1113 = vrot.lane.b32.xlu1 %v1597_v13, %s1713_s12 }
0x189a   :  { %v1114_v15 = vpop.permute.xlu1 %1113 }
0x189b   :  { %v1116_v16 = vmul.f32 %v1114_v15, %v1097_v5 }
0x189d   :  { %1118 = vrot.lane.b32.xlu2 %v1116_v16, %s1714_s3 }
0x18f7   :  { %v1119_v17 = vpop.permute.xlu2 %1118 }
0x18f8   :  { %1121 = vst.msk [vmem:[#allocation2 + $0x20] sm:$0xff] %vm158_vm5, %v1119_v17  ;;  %1469 = vmatmul.msk.f32.vlgmr.msrb.gmra.mxu2 %vm158_vm5, %v1119_v17 }
0x18f9   :  { %1484 = vmatpush.msrb.mxu2 %v1984_v58 }
0x18fb   :  { %1486 = vmatpush.msrb.mxu2 %v1986_v59 }
0x18fd   :  { %1488 = vmatpush.msrb.mxu2 %v1989_v60 }
0x18ff   :  { %1490 = vmatpush.msrb.mxu2 %v1992_v1  ;;  %v1324_v54 = vld [vmem:[#allocation2 + $0x20] sm:$0xff] }
0x197b   :  { %v1142_v8 = vpop.f32.mrf.mxu2 }
0x197c   :  { %v1145_v20 = vadd.f32 %v1142_v8, %v774_v19 }
0x197e   :  { %1598 = vtanh.f32 %v1145_v20  ;;  %v1470_v22 = vmul.f32 -1.442695, %v1145_v20 }
0x1980   :  { %1600 = vpow2.f32 %v1470_v22 }
0x1984   :  { %v1599_v21 = vpop.eup %1598 }
0x1985   :  { %1168 = vrot.lane.b32.xlu0 %v1599_v21, %s1713_s12 }
0x1986   :  { %v1601_v23 = vpop.eup %1600 }
0x1987   :  { %v1149_v24 = vadd.f32 1.0, %v1601_v23 }
0x1989   :  { %1602 = vrcp.f32 %v1149_v24  ;;  %v1161_v1 = vand.u32 2147483648, %v1149_v24  ;;  %vm1155_vm7 = vweird.f32 %v1149_v24  ;;  %v1159_v61 = vand.u32 2147483647, %v1149_v24 }
0x198a   :  { %1604 = vtanh.f32 %v2011_v11 }
0x198b   :  { %v1162_v27 = vor.u32 1.1754944e-38, %v1161_v1  ;;  %vm1160_vm9 = vcmp.eq.f32.partialorder %v1159_v61, 8.507059e+37 }
0x198f   :  { %v1603_v58 = vpop.eup %1602 }
0x1990   :  { %v1151_v59 = vmul.f32 %v1603_v58, %v1149_v24  ;;  %vm1156_vm6 = vweird.f32 %v1603_v58  ;;  %v1605_v29 = vpop.eup %1604 }
0x1991   :  { %vm1157_vm8 = vmor %vm1155_vm7, %vm1156_vm6 }
0x1992   :  { %v1152_v25 = vsub.f32 1.0, %v1151_v59 }
0x1994   :  { %v1153_v60 = vmul.f32 %v1603_v58, %v1152_v25 }
0x1996   :  { %v1154_v26 = vadd.f32 %v1603_v58, %v1153_v60 }
0x1998   :  { %v1158_v62 = vsel %vm1157_vm8, %v1603_v58, %v1154_v26 }
0x1999   :  { %v1163_v28 = vsel %vm1160_vm9, %v1162_v27, %v1158_v62 }
0x199a   :  { %v1166_v30 = vmul.f32 %v1163_v28, %v1110_v12 }
0x19f7   :  { %v1169_v63 = vpop.permute.xlu0 %1168 }
0x19f8   :  { %v1171_v0 = vmul.f32 %v1169_v63, %v1163_v28 }
0x19fa   :  { %1173 = vrot.lane.b32.xlu1 %v1171_v0, %s1714_s3 }
0x1a02   :  { %680 = vrot.lane.b32.xlu1 %v1605_v29, %s1713_s12 }
0x1a6c   :  { %v1174_v31 = vpop.permute.xlu1 %1173 }
0x1a6d   :  { %v2071_v32 = vadd.f32 %v1174_v31, %v1166_v30 }
0x1a6f   :  { %1606 = vtanh.f32 %v2071_v32 }
0x1a70   :  { %1608 = vpow2.f32 %v1451_v34 }
0x1a74   :  { %v681_v48 = vpop.permute.xlu1 %680 }
0x1a75   :  { %v1607_v33 = vpop.eup %1606 }
0x1a76   :  { %1179 = vrot.lane.b32.xlu2 %v1607_v33, %s1713_s12  ;;  %v1609_v35 = vpop.eup %1608 }
0x1a77   :  { %v661_v36 = vadd.f32 1.0, %v1609_v35 }
0x1a79   :  { %1610 = vrcp.f32 %v661_v36  ;;  %v673_v44 = vand.u32 2147483648, %v661_v36  ;;  %vm667_vm11 = vweird.f32 %v661_v36  ;;  %v671_v45 = vand.u32 2147483647, %v661_v36 }
0x1a7b   :  { %v674_v11 = vor.u32 1.1754944e-38, %v673_v44  ;;  %vm672_vm13 = vcmp.eq.f32.partialorder %v671_v45, 8.507059e+37 }
0x1a7f   :  { %v1611_v37 = vpop.eup %1610 }
0x1a80   :  { %v663_v38 = vmul.f32 %v1611_v37, %v661_v36  ;;  %vm668_vm10 = vweird.f32 %v1611_v37 }
0x1a81   :  { %vm669_vm12 = vmor %vm667_vm11, %vm668_vm10 }
0x1a82   :  { %v664_v39 = vsub.f32 1.0, %v663_v38 }
0x1a84   :  { %v665_v40 = vmul.f32 %v1611_v37, %v664_v39 }
0x1a86   :  { %v666_v42 = vadd.f32 %v1611_v37, %v665_v40 }
0x1a88   :  { %v670_v46 = vsel %vm669_vm12, %v1611_v37, %v666_v42 }
0x1a89   :  { %v675_v49 = vsel %vm672_vm13, %v674_v11, %v670_v46 }
0x1a8a   :  { %v683_v50 = vmul.f32 %v681_v48, %v675_v49  ;;  %v678_v4 = vmul.f32 %v675_v49, %v1970_v47 }
0x1ad0   :  { %v1180_v41 = vpop.permute.xlu2 %1179 }
0x1ad1   :  { %v1182_v43 = vmul.f32 %v1180_v41, %v1163_v28 }
0x1ad3   :  { %1184 = vrot.lane.b32.xlu0 %v1182_v43, %s1714_s3 }
0x1adb   :  { %685 = vrot.lane.b32.xlu0 %v683_v50, %s1714_s3 }
0x1b45   :  { %v1185_v51 = vpop.permute.xlu0 %1184 }
0x1b46   :  { %1187 = vst.msk [vmem:[#allocation2 + $0x28] sm:$0xff] %vm158_vm5, %v1185_v51  ;;  %1471 = vmatmul.msk.f32.vlgmr.msra.gmra.mxu1 %vm158_vm5, %v1185_v51 }
0x1b4d   :  { %v686_v3 = vpop.permute.xlu0 %685 }
0x1b4e   :  { %1477 = vmatmul.msk.f32.vlgmr.msrb.gmra.mxu1 %vm158_vm5, %v1322_v52  ;;  %v688_v5 = vadd.f32 %v686_v3, %v678_v4 }
0x1b56   :  { %1478 = vmatmul.msk.f32.gmra.mxu1 %vm158_vm5, %v1323_v53 }
0x1b5e   :  { %1479 = vmatmul.msk.f32.gmra.mxu1 %vm158_vm5, %v1324_v54 }
0x1bc3   :  { %v1208_v57 = vpop.f32.mrf.mxu1 }
0x1bc4   :  { %v1211_v2 = vadd.f32 %v1208_v57, %v777_v56 }
0x1bc6   :  { %1612 = vtanh.f32 %v1211_v2  ;;  %v1472_v47 = vmul.f32 -1.442695, %v1211_v2 }
0x1bc7   :  { %1614 = vtanh.f32 %v688_v5 }
0x1bc8   :  { %1616 = vpow2.f32 %v1472_v47 }
0x1bcb   :  { %v1383_v6 = vpop.f32.mrf.mxu1 }
0x1bcc   :  { %v1613_v7 = vpop.eup %1612  ;;  %v1384_v10 = vadd.f32 %v2017_v14, %v1383_v6 }
0x1bcd   :  { %1234 = vrot.lane.b32.xlu2 %v1613_v7, %s1713_s12  ;;  %v1615_v13 = vpop.eup %1614 }
0x1bce   :  { %1403 = vst [vmem:[#allocation9 + $0x10] sm:$0xff] %v1384_v10  ;;  %v1617_v18 = vpop.eup %1616 }
0x1bcf   :  { %v1215_v19 = vadd.f32 1.0, %v1617_v18 }
0x1bd1   :  { %1618 = vrcp.f32 %v1215_v19  ;;  %v1227_v24 = vand.u32 2147483648, %v1215_v19  ;;  %vm1221_vm15 = vweird.f32 %v1215_v19  ;;  %v1225_v58 = vand.u32 2147483647, %v1215_v19 }
0x1bd3   :  { %v1386_v12 = vpop.f32.mrf.mxu1  ;;  %v1228_v25 = vor.u32 1.1754944e-38, %v1227_v24  ;;  %vm1226_vm2 = vcmp.eq.f32.partialorder %v1225_v58, 8.507059e+37 }
0x1bd4   :  { %v1387_v15 = vadd.f32 %v2017_v14, %v1386_v12 }
0x1bd5   :  { %691 = vrot.lane.b32.xlu2 %v1615_v13, %s1713_s12 }
0x1bd6   :  { %1404 = vst [vmem:[#allocation9 + $0x18] sm:$0xff] %v1387_v15 }
0x1bd7   :  { %v1619_v8 = vpop.eup %1618 }
0x1bd8   :  { %v1217_v20 = vmul.f32 %v1619_v8, %v1215_v19  ;;  %vm1222_vm14 = vweird.f32 %v1619_v8 }
0x1bd9   :  { %vm1223_vm1 = vmor %vm1221_vm15, %vm1222_vm14 }
0x1bda   :  { %v1218_v21 = vsub.f32 1.0, %v1217_v20 }
0x1bdb   :  { %v1389_v16 = vpop.f32.mrf.mxu1 }
0x1bdc   :  { %v1390_v17 = vadd.f32 %v2017_v14, %v1389_v16  ;;  %v1219_v22 = vmul.f32 %v1619_v8, %v1218_v21 }
0x1bde   :  { %1405 = vst [vmem:[#allocation9 + $0x20] sm:$0xff] %v1390_v17  ;;  %v1220_v23 = vadd.f32 %v1619_v8, %v1219_v22 }
0x1be0   :  { %v1224_v59 = vsel %vm1223_vm1, %v1619_v8, %v1220_v23 }
0x1be1   :  { %v1229_v26 = vsel %vm1226_vm2, %v1228_v25, %v1224_v59 }
0x1be2   :  { %v1232_v27 = vmul.f32 %v1229_v26, %v2071_v32  ;;  %v1325_v32 = vld [vmem:[#allocation2 + $0x28] sm:$0xff] }
0x1c27   :  { %v1235_v60 = vpop.permute.xlu2 %1234 }
0x1c28   :  { %v1237_v1 = vmul.f32 %v1235_v60, %v1229_v26 }
0x1c2a   :  { %1239 = vrot.lane.b32.xlu1 %v1237_v1, %s1714_s3 }
0x1c2f   :  { %v692_v61 = vpop.permute.xlu2 %691 }
0x1c30   :  { %v694_v62 = vmul.f32 %v692_v61, %v675_v49 }
0x1c32   :  { %696 = vrot.lane.b32.xlu1 %v694_v62, %s1714_s3 }
0x1c9c   :  { %v1240_v63 = vpop.permute.xlu1 %1239 }
0x1c9d   :  { %v1242_v28 = vadd.f32 %v1240_v63, %v1232_v27 }
0x1c9f   :  { %1620 = vtanh.f32 %v1242_v28 }
0x1ca4   :  { %v697_v0 = vpop.permute.xlu1 %696 }
0x1ca5   :  { %v1621_v29 = vpop.eup %1620  ;;  %700 = vst.msk [vmem:[#allocation2 + $0x38] sm:$0xff] %vm158_vm5, %v697_v0 }
0x1ca6   :  { %1245 = vrot.lane.b32.xlu0 %v1621_v29, %s1713_s12 }
0x1cac   :  { %v708_v30 = vld [vmem:[#allocation2 + $0x38] sm:$0xff] }
0x1cad   :  { %1459 = vmatmul.msk.f32.gmra.mxu3 %vm158_vm5, %v708_v30 }
0x1d18   :  { %v1246_v31 = vpop.permute.xlu0 %1245 }
0x1d19   :  { %v1248_v33 = vmul.f32 %v1246_v31, %v1229_v26 }
0x1d1b   :  { %1250 = vrot.lane.b32.xlu2 %v1248_v33, %s1714_s3 }
0x1d30   :  { %v779_v36 = vpop.f32.mrf.mxu3 }
0x1d31   :  { %v780_v37 = vadd.f32 %v1962_v9, %v779_v36 }
0x1d75   :  { %v1251_v34 = vpop.permute.xlu2 %1250 }
0x1d76   :  { %1253 = vst.msk [vmem:[#allocation2 + $0x30] sm:$0xff] %vm158_vm5, %v1251_v34  ;;  %1473 = vmatmul.msk.f32.vlgmr.msra.gmra.mxu2 %vm158_vm5, %v1251_v34 }
0x1d7d   :  { %v1326_v35 = vld [vmem:[#allocation2 + $0x30] sm:$0xff] }
0x1d7e   :  { %1480 = vmatmul.msk.f32.vlgmr.msrb.gmra.mxu2 %vm158_vm5, %v1325_v32 }
0x1d86   :  { %1481 = vmatmul.msk.f32.gmra.mxu2 %vm158_vm5, %v1326_v35 }
0x1df9   :  { %v1274_v38 = vpop.f32.mrf.mxu2 }
0x1dfa   :  { %v1277_v39 = vadd.f32 %v1274_v38, %v780_v37 }
0x1dfc   :  { %1622 = vtanh.f32 %v1277_v39  ;;  %v1474_v45 = vmul.f32 -1.442695, %v1277_v39 }
0x1dfe   :  { %1624 = vpow2.f32 %v1474_v45 }
0x1e01   :  { %v1392_v40 = vpop.f32.mrf.mxu2 }
0x1e02   :  { %v1623_v41 = vpop.eup %1622  ;;  %v1393_v42 = vadd.f32 %v2017_v14, %v1392_v40 }
0x1e03   :  { %1300 = vrot.lane.b32.xlu0 %v1623_v41, %s1713_s12 }
0x1e04   :  { %1406 = vst [vmem:[#allocation9 + $0x28] sm:$0xff] %v1393_v42  ;;  %v1625_v46 = vpop.eup %1624 }
0x1e05   :  { %v1281_v11 = vadd.f32 1.0, %v1625_v46 }
0x1e07   :  { %1626 = vrcp.f32 %v1281_v11  ;;  %v1293_v52 = vand.u32 2147483648, %v1281_v11  ;;  %vm1287_vm4 = vweird.f32 %v1281_v11  ;;  %v1291_v53 = vand.u32 2147483647, %v1281_v11 }
0x1e09   :  { %v1395_v43 = vpop.f32.mrf.mxu2  ;;  %v1294_v55 = vor.u32 1.1754944e-38, %v1293_v52  ;;  %vm1292_vm6 = vcmp.eq.f32.partialorder %v1291_v53, 8.507059e+37 }
0x1e0a   :  { %v1396_v44 = vadd.f32 %v2017_v14, %v1395_v43 }
0x1e0c   :  { %1407 = vst [vmem:[#allocation9 + $0x30] sm:$0xff] %v1396_v44 }
0x1e0d   :  { %v1627_v9 = vpop.eup %1626 }
0x1e0e   :  { %v1283_v48 = vmul.f32 %v1627_v9, %v1281_v11  ;;  %vm1288_vm3 = vweird.f32 %v1627_v9 }
0x1e0f   :  { %vm1289_vm0 = vmor %vm1287_vm4, %vm1288_vm3 }
0x1e10   :  { %v1284_v49 = vsub.f32 1.0, %v1283_v48 }
0x1e12   :  { %v1285_v50 = vmul.f32 %v1627_v9, %v1284_v49 }
0x1e14   :  { %v1286_v51 = vadd.f32 %v1627_v9, %v1285_v50 }
0x1e16   :  { %v1290_v54 = vsel %vm1289_vm0, %v1627_v9, %v1286_v51 }
0x1e17   :  { %v1295_v57 = vsel %vm1292_vm6, %v1294_v55, %v1290_v54 }
0x1e18   :  { %v1298_v3 = vmul.f32 %v1295_v57, %v1242_v28 }
0x1e75   :  { %v1301_v56 = vpop.permute.xlu0 %1300 }
0x1e76   :  { %v1303_v2 = vmul.f32 %v1301_v56, %v1295_v57 }
0x1e78   :  { %1305 = vrot.lane.b32.xlu1 %v1303_v2, %s1714_s3 }
0x1eea   :  { %v1306_v4 = vpop.permute.xlu1 %1305 }
0x1eeb   :  { %v1308_v5 = vadd.f32 %v1306_v4, %v1298_v3 }
0x1eed   :  { %1628 = vtanh.f32 %v1308_v5 }
0x1ef3   :  { %v1629_v6 = vpop.eup %1628 }
0x1ef4   :  { %1311 = vrot.lane.b32.xlu2 %v1629_v6, %s1713_s12 }
0x1f4e   :  { %v1312_v7 = vpop.permute.xlu2 %1311 }
0x1f4f   :  { %v1314_v10 = vmul.f32 %v1312_v7, %v1295_v57 }
0x1f51   :  { %1316 = vrot.lane.b32.xlu0 %v1314_v10, %s1714_s3 }
0x1fc3   :  { %v1317_v12 = vpop.permute.xlu0 %1316 }
0x1fc4   :  { %1319 = vst.msk [vmem:[#allocation2 + $0x38] sm:$0xff] %vm158_vm5, %v1317_v12 }
0x1fcb   :  { %v1327_v13 = vld [vmem:[#allocation2 + $0x38] sm:$0xff] }
0x1fcc   :  { %1482 = vmatmul.msk.f32.gmra.mxu2 %vm158_vm5, %v1327_v13 }
0x204f   :  { %v1398_v15 = vpop.f32.mrf.mxu2 }
0x2050   :  { %v1399_v16 = vadd.f32 %v2017_v14, %v1398_v15 }
0x2052   :  { %1408 = vst [vmem:[#allocation9 + $0x38] sm:$0xff] %v1399_v16 }
0x2053   :  { %1421 = dma.vmem_to_hbm [thread:$0]  %s1414_s14, 1024, %s1416_s19, [#allocation6], %s1709_s17, %s1709_s17, %s1710_s18  }
0x2054   :  { %1706 = dma.done.wait [#allocation6], 1024  }
0x2055   :  { %1707 = vsyncadd [#allocation6], 4294966272 }
0x2056   :  { %1426 = vsyncpa [#allocation5], 1 }
0x2057   :  { %1427 = vsyncpa [#allocation8], 1 }
0x2058   :  { %1428 = vsyncpa [#allocation6], 1 }

</bundles_post_ra>
